<compile_context>
chip_gen: v7x
topology: tpu7x:2x2x1
jax: 0.10.0
libtpu: 0.0.40
codegen_flags: <defaults>
</compile_context>

<pallas_src>
import functools
import math

import jax
import jax.numpy as jnp
from jax.experimental import pallas as pl
from jax.experimental.pallas import tpu as pltpu

_INV_SQRT2 = 0.7071067811865476


def _cdiv(a, b):
    return -(-a // b)


def _round_up(x, m):
    return ((x + m - 1) // m) * m


def _gelu_exact(x):
    # exact (erf-based) GELU, matching torch.nn.GELU() default
    return 0.5 * x * (1.0 + jax.lax.erf(x * _INV_SQRT2))


# --------------------------- fused MLP kernel --------------------------------
def _mlp_kernel(x_ref, w1_ref, b1_ref, w2_ref, b2_ref, o_ref, *, approximate_gelu):
    # fc1 (fp32 MXU accumulation) + bias + GELU: the hidden activation lives only in
    # VMEM/vregs for this token tile -- it never round-trips HBM.
    h = jnp.dot(x_ref[...], w1_ref[...], preferred_element_type=jnp.float32)
    h = h + b1_ref[...]
    if approximate_gelu:
        h = jax.nn.gelu(h, approximate=True)   # tanh -> EUP slot (optional micro-opt)
    else:
        h = _gelu_exact(h)                     # bit-parity with torch.nn.GELU()
    # fc2 (dropout p=0.0 is identity).  Casting h to the weight dtype feeds the MXU
    # in bf16 when compute_dtype=bf16, while keeping fp32 accumulation.
    y = jnp.dot(h.astype(w2_ref.dtype), w2_ref[...],
                preferred_element_type=jnp.float32)
    o_ref[...] = (y + b2_ref[...]).astype(o_ref.dtype)


def _vmem_caps():
    cap = 64 * 1024 * 1024              # conservative default: v7x physical VMEM/TC
    try:
        info = pltpu.get_tpu_info()
        cap = int(getattr(info, "vmem_capacity_bytes", cap)) or cap
    except Exception:
        pass
    budget = (cap * 3) // 4             # ~25% headroom for compiler scratch
    return cap, budget


def mlp_forward(params, x, *, tm=1024, compute_dtype=None, approximate_gelu=False):
    """Fused MLP forward: fc2(GELU(fc1(x))).  x: (..., in_features)."""
    w1, b1, w2, b2 = params["w1"], params["b1"], params["w2"], params["b2"]
    cin, hidden = w1.shape
    cout = w2.shape[1]
    lead = x.shape[:-1]
    m = int(math.prod(lead)) if lead else 1
    out_dtype = x.dtype

    cd = jnp.dtype(compute_dtype) if compute_dtype is not None else jnp.dtype(x.dtype)
    x2 = x.reshape(m, cin).astype(cd)
    w1c = w1.astype(cd)
    w2c = w2.astype(cd)

    # Lane-dense output: if cout is not a multiple of 128 (SRFormer dim=180), zero-pad
    # the fc2 columns so output stores are unmasked vst.  Only when the blow-up is
    # modest (<= 2x); for tiny cout the extra output HBM writeback would dominate.
    cout_p = cout
    if cout % 128 != 0 and _round_up(cout, 128) <= 2 * cout:
        cout_p = _round_up(cout, 128)
    if cout_p != cout:
        w2c = jnp.pad(w2c, ((0, 0), (0, cout_p - cout)))
        b2p = jnp.pad(b2, (0, cout_p - cout))
    else:
        b2p = b2
    b1c = b1.reshape(1, hidden).astype(jnp.float32)
    b2c = b2p.reshape(1, cout_p).astype(jnp.float32)

    bx = cd.itemsize
    bout = jnp.dtype(out_dtype).itemsize
    # dtype-aware sublane granule for the token axis: f32 -> 8, bf16 -> 16, int8 -> 32.
    granule = 8 * max(1, 4 // min(bx, bout))

    # ---- choose the token tile ----
    tm_eff = min(tm, _round_up(m, granule))
    # Keep >= 2 grid steps when there are enough tokens so both v7x TensorCores get
    # work under dimension_semantics=("parallel",).
    if m >= 2 * granule:
        tm_eff = min(tm_eff, _round_up(_cdiv(m, 2), granule))
    tm_eff = max(granule, _round_up(tm_eff, granule))

    cap, budget = _vmem_caps()

    def vmem_est(t):
        est = (2 * t * cin * bx                    # double-buffered x tiles
               + 2 * t * cout_p * bout             # double-buffered out tiles
               + cin * hidden * bx + hidden * 4    # resident (single-buffered) weights
               + hidden * cout_p * bx + cout_p * 4
               + t * hidden * 4                    # fp32 hidden activation
               + t * hidden * bx                   # cast of hidden feeding fc2
               + t * cout_p * 4)                   # fp32 fc2 accumulator
        return int(est * 1.25)

    # Shrink the tile (never lie to Mosaic with a clamped limit) until spill-free.
    while tm_eff > granule and vmem_est(tm_eff) > budget:
        tm_eff = max(granule, _round_up(tm_eff // 2, granule))

    nsteps = _cdiv(m, tm_eff)
    # Prefer an even step count so the two v7x TensorCores stay balanced.
    if nsteps > 1 and nsteps % 2 == 1:
        alt = max(granule, _round_up(_cdiv(m, nsteps + 1), granule))
        if _cdiv(m, alt) % 2 == 0 and vmem_est(alt) <= budget:
            tm_eff = alt
            nsteps = _cdiv(m, alt)

    est = vmem_est(tm_eff)
    vmem_limit = int(min(cap, max(2 * est, 32 * 1024 * 1024)))

    cost = pl.CostEstimate(
        flops=int(2 * m * (cin * hidden + hidden * cout_p)),
        transcendentals=int(m * hidden),
        bytes_accessed=int(m * cin * bx + cin * hidden * bx
                           + hidden * cout_p * bx + m * cout_p * bout),
    )

    kernel = functools.partial(_mlp_kernel, approximate_gelu=approximate_gelu)

    def build(single_buffer_weights):
        if single_buffer_weights:
            # Constant-index weight/bias blocks: one resident buffer (no revolving
            # double-buffer) -> halves their VMEM footprint.
            wspec = lambda shape: pl.BlockSpec(shape, lambda i: (0, 0),
                                               pipeline_mode=pl.Buffered(1))
        else:
            wspec = lambda shape: pl.BlockSpec(shape, lambda i: (0, 0))
        return pl.pallas_call(
            kernel,
            out_shape=jax.ShapeDtypeStruct((m, cout_p), out_dtype),
            grid=(nsteps,),
            in_specs=[
                pl.BlockSpec((tm_eff, cin), lambda i: (i, 0)),
                wspec((cin, hidden)),
                wspec((1, hidden)),
                wspec((hidden, cout_p)),
                wspec((1, cout_p)),
            ],
            out_specs=pl.BlockSpec((tm_eff, cout_p), lambda i: (i, 0)),
            compiler_params=pltpu.CompilerParams(
                dimension_semantics=("parallel",),
                vmem_limit_bytes=vmem_limit,
            ),
            cost_estimate=cost,
        )

    args = (x2, w1c, b1c, w2c, b2c)
    try:
        out = build(True)(*args)
    except Exception:
        # Fallback if this Pallas build rejects Buffered(1) on constant-index blocks.
        out = build(False)(*args)

    if cout_p != cout:
        out = out[:, :cout]
    return out.reshape(*lead, cout)


# ---------------------- pure-JAX reference (for checking) --------------------
def mlp_reference(params, x):
    h = jnp.dot(x, params["w1"], precision="highest") + params["b1"]
    h = jax.nn.gelu(h, approximate=False)
    return jnp.dot(h, params["w2"], precision="highest") + params["b2"]


if __name__ == "__main__":
    key = jax.random.PRNGKey(0)
    ks = jax.random.split(key, 9)

    # Toy shapes consistent with the module: tokens (B, L, C), L = H*W.
    B, H, W = 2, 16, 16
    Cin, hidden = 4, 32              # out_features defaults to in_features
    L = H * W
    x = jax.random.normal(ks[0], (B, L, Cin), jnp.float32)
    params = dict(
        w1=jax.random.normal(ks[1], (Cin, hidden), jnp.float32) * 0.1,
        b1=jax.random.normal(ks[2], (hidden,), jnp.float32) * 0.1,
        w2=jax.random.normal(ks[3], (hidden, Cin), jnp.float32) * 0.1,
        b2=jax.random.normal(ks[4], (Cin,), jnp.float32) * 0.1,
    )

    # 1) fp32, M = 512 tokens -> 2 grid steps (megacore-friendly), exact numerics.
    out = jax.block_until_ready(mlp_forward(params, x))
    ref = mlp_reference(params, x)
    assert out.shape == (B, L, Cin), out.shape
    assert jnp.allclose(out, ref, atol=1e-4, rtol=1e-4), \
        float(jnp.max(jnp.abs(out - ref)))

    # 2) Token count not a tile multiple -> partial (masked) last block, no jnp.pad.
    x_odd = jax.random.normal(ks[5], (B, 100, Cin), jnp.float32)
    out_odd = jax.block_until_ready(mlp_forward(params, x_odd))
    ref_odd = mlp_reference(params, x_odd)
    assert out_odd.shape == (B, 100, Cin), out_odd.shape
    assert jnp.allclose(out_odd, ref_odd, atol=1e-4, rtol=1e-4), \
        float(jnp.max(jnp.abs(out_odd - ref_odd)))

    # 3) bf16 MXU operands (fp32 accumulation retained) -- the v6e/v7x fast path.
    out_bf16 = jax.block_until_ready(
        mlp_forward(params, x, compute_dtype=jnp.bfloat16))
    assert out_bf16.shape == (B, L, Cin), out_bf16.shape
    assert jnp.allclose(out_bf16, ref, atol=5e-2, rtol=5e-2), \
        float(jnp.max(jnp.abs(out_bf16 - ref)))

    # 4) SRFormer-like feature dims (dim=180, mlp_ratio=2) -> exercises the
    #    lane-dense output path (cout 180 padded to 256 inside the wrapper).
    Cin2, hid2, L2 = 180, 360, 64
    x_big = jax.random.normal(ks[6], (1, L2, Cin2), jnp.float32)
    params2 = dict(
        w1=jax.random.normal(ks[7], (Cin2, hid2), jnp.float32) * 0.05,
        b1=jnp.zeros((hid2,), jnp.float32),
        w2=jax.random.normal(ks[8], (hid2, Cin2), jnp.float32) * 0.05,
        b2=jnp.zeros((Cin2,), jnp.float32),
    )
    out_big = jax.block_until_ready(mlp_forward(params2, x_big))
    ref_big = mlp_reference(params2, x_big)
    assert out_big.shape == (1, L2, Cin2), out_big.shape
    assert jnp.allclose(out_big, ref_big, atol=5e-3, rtol=5e-3), \
        float(jnp.max(jnp.abs(out_big - ref_big)))

    # TODO(synk): dropout with p>0.0 would need pltpu.prng_seed/prng_random_bits;
    # the module uses p=0.0 so it is an identity here.
    print("KERNEL_OK")
</pallas_src>

<mosaic_0001>
module attributes {stable_mosaic.version = 11 : i64} {
  func.func @_mlp_kernel(%arg0: i32, %arg1: memref<256x4xf32, #tpu.memory_space<vmem>>, %arg2: memref<4x32xf32, #tpu.memory_space<vmem>>, %arg3: memref<1x32xf32, #tpu.memory_space<vmem>>, %arg4: memref<32x4xf32, #tpu.memory_space<vmem>>, %arg5: memref<1x4xf32, #tpu.memory_space<vmem>>, %arg6: memref<256x4xf32, #tpu.memory_space<vmem>>) attributes {dimension_semantics = [#tpu.dimension_semantics<parallel>], iteration_bounds = array<i64: 2>, scalar_prefetch = 0 : i64, scratch_operands = 0 : i64, tpu.core_type = #tpu.core_type<tc>, window_params = [{transform_indices = @transform_0, window_bounds = array<i64: 256, 4>}, {pipeline_mode = #tpu.pipeline_mode<synchronous>, transform_indices = @transform_1, window_bounds = array<i64: 4, 32>}, {pipeline_mode = #tpu.pipeline_mode<synchronous>, transform_indices = @transform_2, window_bounds = array<i64: 1, 32>}, {pipeline_mode = #tpu.pipeline_mode<synchronous>, transform_indices = @transform_3, window_bounds = array<i64: 32, 4>}, {pipeline_mode = #tpu.pipeline_mode<synchronous>, transform_indices = @transform_4, window_bounds = array<i64: 1, 4>}, {transform_indices = @transform_5, window_bounds = array<i64: 256, 4>}]} {
    %c0 = arith.constant 0 : index
    %c0_0 = arith.constant 0 : index
    %0 = vector.load %arg1[%c0, %c0_0] : memref<256x4xf32, #tpu.memory_space<vmem>>, vector<256x4xf32>
    %c0_1 = arith.constant 0 : index
    %c0_2 = arith.constant 0 : index
    %1 = vector.load %arg2[%c0_1, %c0_2] : memref<4x32xf32, #tpu.memory_space<vmem>>, vector<4x32xf32>
    %cst = arith.constant dense<0.000000e+00> : vector<256x32xf32>
    %2 = tpu.matmul %0, %1, %cst {dimension_numbers = #tpu.dot_dimension_numbers<[1], [0], [0], [1], [0, 0, 1, 1], [], []>} : vector<256x4xf32>, vector<4x32xf32>, vector<256x32xf32> -> vector<256x32xf32>
    %c0_3 = arith.constant 0 : index
    %c0_4 = arith.constant 0 : index
    %3 = vector.load %arg3[%c0_3, %c0_4] : memref<1x32xf32, #tpu.memory_space<vmem>>, vector<1x32xf32>
    %4 = vector.broadcast %3 : vector<1x32xf32> to vector<256x32xf32>
    %5 = arith.addf %2, %4 : vector<256x32xf32>
    %cst_5 = arith.constant 5.000000e-01 : f32
    %6 = vector.broadcast %cst_5 : f32 to vector<256x32xf32>
    %7 = arith.mulf %6, %5 : vector<256x32xf32>
    %cst_6 = arith.constant 0.707106769 : f32
    %8 = vector.broadcast %cst_6 : f32 to vector<256x32xf32>
    %9 = arith.mulf %5, %8 : vector<256x32xf32>
    %10 = math.erf %9 : vector<256x32xf32>
    %cst_7 = arith.constant 1.000000e+00 : f32
    %11 = vector.broadcast %cst_7 : f32 to vector<256x32xf32>
    %12 = arith.addf %11, %10 : vector<256x32xf32>
    %13 = arith.mulf %7, %12 : vector<256x32xf32>
    %c0_8 = arith.constant 0 : index
    %c0_9 = arith.constant 0 : index
    %14 = vector.load %arg4[%c0_8, %c0_9] : memref<32x4xf32, #tpu.memory_space<vmem>>, vector<32x4xf32>
    %cst_10 = arith.constant dense<0.000000e+00> : vector<256x4xf32>
    %15 = tpu.matmul %13, %14, %cst_10 {dimension_numbers = #tpu.dot_dimension_numbers<[1], [0], [0], [1], [0, 0, 1, 1], [], []>} : vector<256x32xf32>, vector<32x4xf32>, vector<256x4xf32> -> vector<256x4xf32>
    %c0_11 = arith.constant 0 : index
    %c0_12 = arith.constant 0 : index
    %16 = vector.load %arg5[%c0_11, %c0_12] : memref<1x4xf32, #tpu.memory_space<vmem>>, vector<1x4xf32>
    %17 = vector.broadcast %16 : vector<1x4xf32> to vector<256x4xf32>
    %18 = arith.addf %15, %17 : vector<256x4xf32>
    %c0_13 = arith.constant 0 : index
    %c0_14 = arith.constant 0 : index
    %19 = vector.load %arg6[%c0_13, %c0_14] : memref<256x4xf32, #tpu.memory_space<vmem>>, vector<256x4xf32>
    tpu.vector_store %arg6[%c0_13, %c0_14], %18 {strides = array<i32>} : memref<256x4xf32, #tpu.memory_space<vmem>>, vector<256x4xf32>,
    return
  }
  func.func @transform_0(%arg0: i32) -> (i32, i32) {
    %c0_i32 = arith.constant 0 : i32
    %c0_i32_0 = arith.constant 0 : i32
    return %arg0, %c0_i32 : i32, i32
  }
  func.func @transform_1(%arg0: i32) -> (i32, i32) {
    %c0_i32 = arith.constant 0 : i32
    %c0_i32_0 = arith.constant 0 : i32
    %c0_i32_1 = arith.constant 0 : i32
    return %c0_i32, %c0_i32_0 : i32, i32
  }
  func.func @transform_2(%arg0: i32) -> (i32, i32) {
    %c0_i32 = arith.constant 0 : i32
    %c0_i32_0 = arith.constant 0 : i32
    %c0_i32_1 = arith.constant 0 : i32
    return %c0_i32, %c0_i32_0 : i32, i32
  }
  func.func @transform_3(%arg0: i32) -> (i32, i32) {
    %c0_i32 = arith.constant 0 : i32
    %c0_i32_0 = arith.constant 0 : i32
    %c0_i32_1 = arith.constant 0 : i32
    return %c0_i32, %c0_i32_0 : i32, i32
  }
  func.func @transform_4(%arg0: i32) -> (i32, i32) {
    %c0_i32 = arith.constant 0 : i32
    %c0_i32_0 = arith.constant 0 : i32
    %c0_i32_1 = arith.constant 0 : i32
    return %c0_i32, %c0_i32_0 : i32, i32
  }
  func.func @transform_5(%arg0: i32) -> (i32, i32) {
    %c0_i32 = arith.constant 0 : i32
    %c0_i32_0 = arith.constant 0 : i32
    return %arg0, %c0_i32 : i32, i32
  }
}

module attributes {stable_mosaic.version = 11 : i64} {
  func.func @_mlp_kernel(%arg0: i32, %arg1: memref<256x4xf32, #tpu.memory_space<vmem>>, %arg2: memref<4x32xf32, #tpu.memory_space<vmem>>, %arg3: memref<1x32xf32, #tpu.memory_space<vmem>>, %arg4: memref<32x4xf32, #tpu.memory_space<vmem>>, %arg5: memref<1x4xf32, #tpu.memory_space<vmem>>, %arg6: memref<256x4xf32, #tpu.memory_space<vmem>>) attributes {dimension_semantics = [#tpu.dimension_semantics<parallel>], iteration_bounds = array<i64: 2>, scalar_prefetch = 0 : i64, scratch_operands = 0 : i64, tpu.core_type = #tpu.core_type<tc>, window_params = [{transform_indices = @transform_0, window_bounds = array<i64: 256, 4>}, {pipeline_mode = #tpu.pipeline_mode<synchronous>, transform_indices = @transform_1, window_bounds = array<i64: 4, 32>}, {pipeline_mode = #tpu.pipeline_mode<synchronous>, transform_indices = @transform_2, window_bounds = array<i64: 1, 32>}, {pipeline_mode = #tpu.pipeline_mode<synchronous>, transform_indices = @transform_3, window_bounds = array<i64: 32, 4>}, {pipeline_mode = #tpu.pipeline_mode<synchronous>, transform_indices = @transform_4, window_bounds = array<i64: 1, 4>}, {transform_indices = @transform_5, window_bounds = array<i64: 256, 4>}]} {
    %c0 = arith.constant 0 : index
    %c0_0 = arith.constant 0 : index
    %0 = vector.load %arg1[%c0, %c0_0] : memref<256x4xf32, #tpu.memory_space<vmem>>, vector<256x4xf32>
    %c0_1 = arith.constant 0 : index
    %c0_2 = arith.constant 0 : index
    %1 = vector.load %arg2[%c0_1, %c0_2] : memref<4x32xf32, #tpu.memory_space<vmem>>, vector<4x32xf32>
    %cst = arith.constant dense<0.000000e+00> : vector<256x32xf32>
    %2 = tpu.matmul %0, %1, %cst {dimension_numbers = #tpu.dot_dimension_numbers<[1], [0], [0], [1], [0, 0, 1, 1], [], []>} : vector<256x4xf32>, vector<4x32xf32>, vector<256x32xf32> -> vector<256x32xf32>
    %c0_3 = arith.constant 0 : index
    %c0_4 = arith.constant 0 : index
    %3 = vector.load %arg3[%c0_3, %c0_4] : memref<1x32xf32, #tpu.memory_space<vmem>>, vector<1x32xf32>
    %4 = vector.broadcast %3 : vector<1x32xf32> to vector<256x32xf32>
    %5 = arith.addf %2, %4 : vector<256x32xf32>
    %cst_5 = arith.constant 5.000000e-01 : f32
    %6 = vector.broadcast %cst_5 : f32 to vector<256x32xf32>
    %7 = arith.mulf %6, %5 : vector<256x32xf32>
    %cst_6 = arith.constant 0.707106769 : f32
    %8 = vector.broadcast %cst_6 : f32 to vector<256x32xf32>
    %9 = arith.mulf %5, %8 : vector<256x32xf32>
    %10 = math.erf %9 : vector<256x32xf32>
    %cst_7 = arith.constant 1.000000e+00 : f32
    %11 = vector.broadcast %cst_7 : f32 to vector<256x32xf32>
    %12 = arith.addf %11, %10 : vector<256x32xf32>
    %13 = arith.mulf %7, %12 : vector<256x32xf32>
    %c0_8 = arith.constant 0 : index
    %c0_9 = arith.constant 0 : index
    %14 = vector.load %arg4[%c0_8, %c0_9] : memref<32x4xf32, #tpu.memory_space<vmem>>, vector<32x4xf32>
    %cst_10 = arith.constant dense<0.000000e+00> : vector<256x4xf32>
    %15 = tpu.matmul %13, %14, %cst_10 {dimension_numbers = #tpu.dot_dimension_numbers<[1], [0], [0], [1], [0, 0, 1, 1], [], []>} : vector<256x32xf32>, vector<32x4xf32>, vector<256x4xf32> -> vector<256x4xf32>
    %c0_11 = arith.constant 0 : index
    %c0_12 = arith.constant 0 : index
    %16 = vector.load %arg5[%c0_11, %c0_12] : memref<1x4xf32, #tpu.memory_space<vmem>>, vector<1x4xf32>
    %17 = vector.broadcast %16 : vector<1x4xf32> to vector<256x4xf32>
    %18 = arith.addf %15, %17 : vector<256x4xf32>
    %c0_13 = arith.constant 0 : index
    %c0_14 = arith.constant 0 : index
    %19 = vector.load %arg6[%c0_13, %c0_14] : memref<256x4xf32, #tpu.memory_space<vmem>>, vector<256x4xf32>
    tpu.vector_store %arg6[%c0_13, %c0_14], %18 {strides = array<i32>} : memref<256x4xf32, #tpu.memory_space<vmem>>, vector<256x4xf32>,
    return
  }
  func.func @transform_0(%arg0: i32) -> (i32, i32) {
    %c0_i32 = arith.constant 0 : i32
    %c0_i32_0 = arith.constant 0 : i32
    return %arg0, %c0_i32 : i32, i32
  }
  func.func @transform_1(%arg0: i32) -> (i32, i32) {
    %c0_i32 = arith.constant 0 : i32
    %c0_i32_0 = arith.constant 0 : i32
    %c0_i32_1 = arith.constant 0 : i32
    return %c0_i32, %c0_i32_0 : i32, i32
  }
  func.func @transform_2(%arg0: i32) -> (i32, i32) {
    %c0_i32 = arith.constant 0 : i32
    %c0_i32_0 = arith.constant 0 : i32
    %c0_i32_1 = arith.constant 0 : i32
    return %c0_i32, %c0_i32_0 : i32, i32
  }
  func.func @transform_3(%arg0: i32) -> (i32, i32) {
    %c0_i32 = arith.constant 0 : i32
    %c0_i32_0 = arith.constant 0 : i32
    %c0_i32_1 = arith.constant 0 : i32
    return %c0_i32, %c0_i32_0 : i32, i32
  }
  func.func @transform_4(%arg0: i32) -> (i32, i32) {
    %c0_i32 = arith.constant 0 : i32
    %c0_i32_0 = arith.constant 0 : i32
    %c0_i32_1 = arith.constant 0 : i32
    return %c0_i32, %c0_i32_0 : i32, i32
  }
  func.func @transform_5(%arg0: i32) -> (i32, i32) {
    %c0_i32 = arith.constant 0 : i32
    %c0_i32_0 = arith.constant 0 : i32
    return %arg0, %c0_i32 : i32, i32
  }
}

</mosaic_0001>

<bundles_post_ra>
// kernel: tpu_custom_call.1
= control target key start
LH: loop header
LB: loop body
LE: loop exit
PB: predicated region body
PF: predicated region fallthrough
CT: control target
= control target key end

     0   :  { %s1546_s18 = smov 0   ;;  %s1899_s0 = inlined_call_operand.vmem [shape: f32[512,4], index: 0, kind: input, shape index: {}]   ;;  %s1900_s1 = inlined_call_operand.vmem [shape: f32[4,32], index: 1, kind: input, shape index: {}]   ;;  %s1901_s2 = inlined_call_operand.vmem [shape: f32[1,32], index: 2, kind: input, shape index: {}]   ;;  %s1902_s3 = inlined_call_operand.vmem [shape: f32[32,4], index: 3, kind: input, shape index: {}]   ;;  %s1903_s4 = inlined_call_operand.vmem [shape: f32[1,4], index: 4, kind: input, shape index: {}]   ;;  %s1904_s5 = inlined_call_operand.vmem [shape: f32[512,4], index: 5, kind: output, shape index: {}]  }
   0x1 LB: > { %s1175_s19 = sadd.s32 4294967295, %s1514_s18   ;;  %p1179_p0 = scmp.ge.s32.totalorder %s1514_s18, 1  ;;  %s1514_s18 = sphi %s1546_s18, %s15_s18  }
   0x2   : > { %p188_p1 = scmp.lt.s32.totalorder %s1514_s18, 3 }
   0x4   : > { %p189_p2 = pnand %p1179_p0, %p188_p1 }
   0x5   : > { %v260_v0 = vld [vmem:[%s1900_s1] sm:$0xf] (!%p189_p2)  ;;  %vm365_vm0 = vcmask (!%p189_p2), 1043456   ;;  %s1180_s22 = sshll.u32 (!%p189_p2), %s1175_s19, 5  ;;  %vm268_vm1 = vcmask (!%p189_p2), 31744   ;;  %v755_v34 = vld [vmem:[%s1902_s3 + $0x8] sm:$0xff] (!%p189_p2) }
   0x6   : > { %192 = sbr.rel (%p189_p2) target bundleno = 527 (0x20f), region = 40  ;;  %1322 = vmatprep.subr.msk.mxu0 (!%p189_p2), %vm365_vm0, %v260_v0  ;;  %p217_p3 = scmp.lt.s32.totalorder (!%p189_p2), %s1180_s22, 63  ;;  %v754_v33 = vld [vmem:[%s1902_s3] sm:$0xff] (!%p189_p2)  ;;  %v756_v36 = vld [vmem:[%s1902_s3 + $0x10] sm:$0xff] (!%p189_p2)  ;;  %v757_v37 = vld [vmem:[%s1902_s3 + $0x18] sm:$0xff] (!%p189_p2)  ;;  %vm765_vm2 = vcmask (!%p189_p2), 261120  }
   0x7   : > { %1323 = vmatpush3.msk.msra.mxu0 (!%p189_p2), %vm365_vm0, %v260_v0  ;;  %v1428_v35 = vpack.c.bf16 (!%p189_p2), %v755_v34, %v754_v33  ;;  %v1432_v38 = vpack.c.bf16 (!%p189_p2), %v757_v37, %v756_v36  ;;  %v1646_v39 = vld [vmem:[%s1901_s2] ss:$0 sm:$0xff] (!%p189_p2) }
   0x9   : > { %1429 = vmatprep.subr.bf16.mxu1 (!%p189_p2), %v1428_v35 }
   0xa   : > { %1431 = vmatpush3.bf16.msra.mxu1 (!%p189_p2), %v1428_v35 }
   0xb   : > { %1433 = vmatprep.subr.bf16.mxu1 (!%p189_p2), %v1432_v38 }
   0xd   : > { %s1906_s22 = smov (!%p217_p3, %s1180_s22), 63 }
   0xe   : > { %s1181_s23 = sshll.u32 %s1906_s22, 3  ;;  %1435 = vmatpush3.bf16.msra.mxu1 %v1432_v38 }
   0xf   : > { %s1565_s26 = scalar_lea.vmem %s1899_s0, %s1181_s23  ;;  %s1798_s16 = scalar_lea.vmem %s1904_s5, %s1181_s23 }
  0x10   : > { %v228_v1 = vld [vmem:[%s1565_s26] sm:$0xff]  ;;  %v229_v2 = vld [vmem:[%s1565_s26 + $0x8] sm:$0xff]  ;;  %v230_v3 = vld [vmem:[%s1565_s26 + $0x10] sm:$0xff] }
  0x11   : > { %1324 = vmatprep.mubr.msk.f32.mxu0 %vm268_vm1, %v228_v1  ;;  %v231_v4 = vld [vmem:[%s1565_s26 + $0x18] sm:$0xff]  ;;  %v232_v5 = vld [vmem:[%s1565_s26 + $0x20] sm:$0xff]  ;;  %v233_v6 = vld [vmem:[%s1565_s26 + $0x28] sm:$0xff] }
  0x12   : > { %1325 = vmatmul.mubr.msk.f32.vlgmr.msra.gmra.mrb[0].mxu0 %vm268_vm1, %v229_v2  ;;  %v234_v7 = vld [vmem:[%s1565_s26 + $0x30] sm:$0xff]  ;;  %v235_v8 = vld [vmem:[%s1565_s26 + $0x38] sm:$0xff]  ;;  %v236_v9 = vld [vmem:[%s1565_s26 + $0x40] sm:$0xff] }
  0x13   : > { %1327 = vmatprep.mubr.msk.f32.mxu0 %vm268_vm1, %v230_v3  ;;  %v237_v10 = vld [vmem:[%s1565_s26 + $0x48] sm:$0xff]  ;;  %v238_v11 = vld [vmem:[%s1565_s26 + $0x50] sm:$0xff]  ;;  %v239_v12 = vld [vmem:[%s1565_s26 + $0x58] sm:$0xff] }
  0x14   : > { %v240_v13 = vld [vmem:[%s1565_s26 + $0x60] sm:$0xff]  ;;  %v241_v14 = vld [vmem:[%s1565_s26 + $0x68] sm:$0xff]  ;;  %v242_v15 = vld [vmem:[%s1565_s26 + $0x70] sm:$0xff] }
  0x15   : > { %v243_v16 = vld [vmem:[%s1565_s26 + $0x78] sm:$0xff]  ;;  %v244_v17 = vld [vmem:[%s1565_s26 + $0x80] sm:$0xff]  ;;  %v245_v18 = vld [vmem:[%s1565_s26 + $0x88] sm:$0xff] }
  0x16   : > { %1328 = vmatmul.mubr.msk.f32.gmra.mrb[2].mxu0 %vm268_vm1, %v231_v4  ;;  %v246_v19 = vld [vmem:[%s1565_s26 + $0x90] sm:$0xff]  ;;  %v247_v20 = vld [vmem:[%s1565_s26 + $0x98] sm:$0xff]  ;;  %v248_v21 = vld [vmem:[%s1565_s26 + $0xa0] sm:$0xff] }
  0x17   : > { %1330 = vmatprep.mubr.msk.f32.mxu0 %vm268_vm1, %v232_v5  ;;  %v249_v22 = vld [vmem:[%s1565_s26 + $0xa8] sm:$0xff]  ;;  %v250_v23 = vld [vmem:[%s1565_s26 + $0xb0] sm:$0xff]  ;;  %v251_v24 = vld [vmem:[%s1565_s26 + $0xb8] sm:$0xff] }
  0x18   : > { %v252_v25 = vld [vmem:[%s1565_s26 + $0xc0] sm:$0xff]  ;;  %v253_v26 = vld [vmem:[%s1565_s26 + $0xc8] sm:$0xff]  ;;  %v254_v27 = vld [vmem:[%s1565_s26 + $0xd0] sm:$0xff] }
  0x19   : > { %v255_v28 = vld [vmem:[%s1565_s26 + $0xd8] sm:$0xff]  ;;  %v256_v29 = vld [vmem:[%s1565_s26 + $0xe0] sm:$0xff]  ;;  %v257_v30 = vld [vmem:[%s1565_s26 + $0xe8] sm:$0xff] }
  0x1a   : > { %1331 = vmatmul.mubr.msk.f32.gmra.mrb[4].mxu0 %vm268_vm1, %v233_v6  ;;  %v258_v31 = vld [vmem:[%s1565_s26 + $0xf0] sm:$0xff]  ;;  %v259_v32 = vld [vmem:[%s1565_s26 + $0xf8] sm:$0xff] }
  0x1b   : > { %1333 = vmatprep.mubr.msk.f32.mxu0 %vm268_vm1, %v234_v7 }
  0x1e   : > { %1334 = vmatmul.mubr.msk.f32.gmra.mrb[6].mxu0 %vm268_vm1, %v235_v8 }
  0x1f   : > { %1336 = vmatprep.mubr.msk.f32.mxu0 %vm268_vm1, %v236_v9 }
  0x22   : > { %1337 = vmatmul.mubr.msk.f32.gmra.mrb[8].mxu0 %vm268_vm1, %v237_v10 }
  0x23   : > { %1339 = vmatprep.mubr.msk.f32.mxu0 %vm268_vm1, %v238_v11 }
  0x26   : > { %1340 = vmatmul.mubr.msk.f32.gmra.mrb[10].mxu0 %vm268_vm1, %v239_v12 }
  0x27   : > { %1342 = vmatprep.mubr.msk.f32.mxu0 %vm268_vm1, %v240_v13 }
  0x2a   : > { %1343 = vmatmul.mubr.msk.f32.gmra.mrb[12].mxu0 %vm268_vm1, %v241_v14 }
  0x2b   : > { %1345 = vmatprep.mubr.msk.f32.mxu0 %vm268_vm1, %v242_v15 }
  0x2e   : > { %1346 = vmatmul.mubr.msk.f32.gmra.mrb[14].mxu0 %vm268_vm1, %v243_v16 }
  0x2f   : > { %1348 = vmatprep.mubr.msk.f32.mxu0 %vm268_vm1, %v244_v17 }
  0x32   : > { %1349 = vmatmul.mubr.msk.f32.gmra.mrb[16].mxu0 %vm268_vm1, %v245_v18 }
  0x33   : > { %1351 = vmatprep.mubr.msk.f32.mxu0 %vm268_vm1, %v246_v19 }
  0x36   : > { %1352 = vmatmul.mubr.msk.f32.gmra.mrb[18].mxu0 %vm268_vm1, %v247_v20 }
  0x37   : > { %1354 = vmatprep.mubr.msk.f32.mxu0 %vm268_vm1, %v248_v21 }
  0x3a   : > { %1355 = vmatmul.mubr.msk.f32.gmra.mrb[20].mxu0 %vm268_vm1, %v249_v22 }
  0x3b   : > { %1357 = vmatprep.mubr.msk.f32.mxu0 %vm268_vm1, %v250_v23 }
  0x3e   : > { %1358 = vmatmul.mubr.msk.f32.gmra.mrb[22].mxu0 %vm268_vm1, %v251_v24 }
  0x3f   : > { %1360 = vmatprep.mubr.msk.f32.mxu0 %vm268_vm1, %v252_v25 }
  0x42   : > { %1361 = vmatmul.mubr.msk.f32.gmra.mrb[24].mxu0 %vm268_vm1, %v253_v26 }
  0x43   : > { %1363 = vmatprep.mubr.msk.f32.mxu0 %vm268_vm1, %v254_v27 }
  0x46   : > { %1364 = vmatmul.mubr.msk.f32.gmra.mrb[26].mxu0 %vm268_vm1, %v255_v28 }
  0x47   : > { %1366 = vmatprep.mubr.msk.f32.mxu0 %vm268_vm1, %v256_v29 }
  0x4a   : > { %1367 = vmatmul.mubr.msk.f32.gmra.mrb[28].mxu0 %vm268_vm1, %v257_v30 }
  0x4b   : > { %1369 = vmatprep.mubr.msk.f32.mxu0 %vm268_vm1, %v258_v31 }
  0x4e   : > { %1370 = vmatmul.mubr.msk.f32.gmra.mrb[30].mxu0 %vm268_vm1, %v259_v32 }
  0xe5   : > { %v1326_v40 = vpop.f32.mrb[0].mxu0 }
  0xe6   : > { %v441_v41 = vadd.f32 %v1326_v40, %v1646_v39  ;;  %v435_v42 = vpop.f32.mrb[1].mxu0 }
  0xe7   : > { %v436_v43 = vadd.f32 %v1646_v39, %v435_v42 }
  0xe8   : > { %v627_v44 = vmul.f32 0.70710677, %v441_v41  ;;  %v595_v8 = vmul.f32 0.5, %v441_v41 }
  0xe9   : > { %v626_v45 = vmul.f32 0.70710677, %v436_v43  ;;  %v1329_v46 = vpop.f32.mrb[2].mxu0  ;;  %v594_v4 = vmul.f32 0.5, %v436_v43 }
  0xea   : > { %1444 = verf.f32 %v627_v44  ;;  %v451_v47 = vadd.f32 %v1329_v46, %v1646_v39  ;;  %v445_v48 = vpop.f32.mrb[3].mxu0 }
  0xeb   : > { %1446 = verf.f32 %v626_v45  ;;  %v446_v49 = vadd.f32 %v1646_v39, %v445_v48 }
  0xec   : > { %v629_v50 = vmul.f32 0.70710677, %v451_v47  ;;  %v597_v22 = vmul.f32 0.5, %v451_v47 }
  0xed   : > { %v628_v51 = vmul.f32 0.70710677, %v446_v49  ;;  %v1332_v52 = vpop.f32.mrb[4].mxu0  ;;  %v596_v18 = vmul.f32 0.5, %v446_v49 }
  0xee   : > { %1448 = verf.f32 %v629_v50  ;;  %v461_v53 = vadd.f32 %v1332_v52, %v1646_v39  ;;  %v455_v54 = vpop.f32.mrb[5].mxu0 }
  0xef   : > { %1450 = verf.f32 %v628_v51  ;;  %v456_v55 = vadd.f32 %v1646_v39, %v455_v54 }
  0xf0   : > { %v631_v56 = vmul.f32 0.70710677, %v461_v53  ;;  %v599_v36 = vmul.f32 0.5, %v461_v53 }
  0xf1   : > { %v630_v57 = vmul.f32 0.70710677, %v456_v55  ;;  %v1335_v58 = vpop.f32.mrb[6].mxu0  ;;  %v598_v32 = vmul.f32 0.5, %v456_v55 }
  0xf2   : > { %1452 = verf.f32 %v631_v56  ;;  %v1655_v59 = vadd.f32 %v1335_v58, %v1646_v39  ;;  %v465_v60 = vpop.f32.mrb[7].mxu0 }
  0xf3   : > { %1454 = verf.f32 %v630_v57  ;;  %v466_v61 = vadd.f32 %v1646_v39, %v465_v60 }
  0xf4   : > { %v1445_v62 = vpop.eup %1444  ;;  %v633_v63 = vmul.f32 0.70710677, %v1655_v59  ;;  %v601_v51 = vmul.f32 0.5, %v1655_v59 }
  0xf5   : > { %v1447_v0 = vpop.eup %1446  ;;  %v691_v1 = vadd.f32 1.0, %v1445_v62  ;;  %v632_v2 = vmul.f32 0.70710677, %v466_v61  ;;  %v1338_v3 = vpop.f32.mrb[8].mxu0  ;;  %v600_v47 = vmul.f32 0.5, %v466_v61 }
  0xf6   : > { %1456 = verf.f32 %v633_v63  ;;  %v1660_v5 = vadd.f32 %v1338_v3, %v1646_v39  ;;  %v475_v6 = vpop.f32.mrb[9].mxu0  ;;  %v690_v7 = vadd.f32 1.0, %v1447_v0 }
  0xf7   : > { %1458 = verf.f32 %v632_v2  ;;  %v1663_v9 = vadd.f32 %v1646_v39, %v475_v6  ;;  %v723_v14 = vmul.f32 %v691_v1, %v595_v8 }
  0xf8   : > { %v1449_v10 = vpop.eup %1448  ;;  %v635_v11 = vmul.f32 0.70710677, %v1660_v5  ;;  %v722_v12 = vmul.f32 %v690_v7, %v594_v4  ;;  %v603_v1 = vmul.f32 0.5, %v1660_v5 }
  0xf9   : > { %v1451_v13 = vpop.eup %1450  ;;  %v693_v15 = vadd.f32 1.0, %v1449_v10  ;;  %v634_v16 = vmul.f32 0.70710677, %v1663_v9  ;;  %v1341_v17 = vpop.f32.mrb[10].mxu0  ;;  %v602_v62 = vmul.f32 0.5, %v1663_v9 }
  0xfa   : > { %v692_v19 = vadd.f32 1.0, %v1451_v13  ;;  %1460 = verf.f32 %v635_v11  ;;  %v1668_v20 = vadd.f32 %v1341_v17, %v1646_v39  ;;  %v485_v21 = vpop.f32.mrb[11].mxu0  ;;  %1380 = vmatprep.mubr.msk.f32.mxu1 %vm765_vm2, %v722_v12 }
  0xfb   : > { %1462 = verf.f32 %v634_v16  ;;  %v1672_v23 = vadd.f32 %v1646_v39, %v485_v21  ;;  %1381 = vmatmul.mubr.msk.f32.vlgmr.msra.gmra.mrb[0].mxu1 %vm765_vm2, %v723_v14  ;;  %v725_v28 = vmul.f32 %v693_v15, %v597_v22 }
  0xfc   : > { %v1453_v24 = vpop.eup %1452  ;;  %v724_v25 = vmul.f32 %v692_v19, %v596_v18  ;;  %v637_v26 = vmul.f32 0.70710677, %v1668_v20  ;;  %v605_v15 = vmul.f32 0.5, %v1668_v20 }
  0xfd   : > { %v1455_v27 = vpop.eup %1454  ;;  %v695_v29 = vadd.f32 1.0, %v1453_v24  ;;  %v636_v30 = vmul.f32 0.70710677, %v1672_v23  ;;  %v1344_v31 = vpop.f32.mrb[12].mxu0  ;;  %v604_v12 = vmul.f32 0.5, %v1672_v23 }
  0xfe   : > { %v694_v33 = vadd.f32 1.0, %v1455_v27  ;;  %1464 = verf.f32 %v637_v26  ;;  %v1678_v34 = vadd.f32 %v1344_v31, %v1646_v39  ;;  %v495_v35 = vpop.f32.mrb[13].mxu0  ;;  %1383 = vmatprep.mubr.msk.f32.mxu1 %vm765_vm2, %v724_v25 }
  0xff   : > { %1466 = verf.f32 %v636_v30  ;;  %v1682_v37 = vadd.f32 %v1646_v39, %v495_v35  ;;  %1384 = vmatmul.mubr.msk.f32.gmra.mrb[2].mxu1 %vm765_vm2, %v725_v28  ;;  %v727_v43 = vmul.f32 %v695_v29, %v599_v36 }
 0x100   : > { %v1457_v38 = vpop.eup %1456  ;;  %v726_v40 = vmul.f32 %v694_v33, %v598_v32  ;;  %v639_v41 = vmul.f32 0.70710677, %v1678_v34  ;;  %v607_v29 = vmul.f32 0.5, %v1678_v34 }
 0x101   : > { %v1459_v42 = vpop.eup %1458  ;;  %v697_v44 = vadd.f32 1.0, %v1457_v38  ;;  %v638_v45 = vmul.f32 0.70710677, %v1682_v37  ;;  %v1347_v46 = vpop.f32.mrb[14].mxu0  ;;  %v606_v26 = vmul.f32 0.5, %v1682_v37 }
 0x102   : > { %v696_v48 = vadd.f32 1.0, %v1459_v42  ;;  %1468 = verf.f32 %v639_v41  ;;  %v1688_v49 = vadd.f32 %v1347_v46, %v1646_v39  ;;  %v505_v50 = vpop.f32.mrb[15].mxu0  ;;  %1386 = vmatprep.mubr.msk.f32.mxu1 %vm765_vm2, %v726_v40 }
 0x103   : > { %1470 = verf.f32 %v638_v45  ;;  %v1693_v52 = vadd.f32 %v1646_v39, %v505_v50  ;;  %1387 = vmatmul.mubr.msk.f32.gmra.mrb[4].mxu1 %vm765_vm2, %v727_v43  ;;  %v729_v57 = vmul.f32 %v697_v44, %v601_v51 }
 0x104   : > { %v1461_v53 = vpop.eup %1460  ;;  %v728_v54 = vmul.f32 %v696_v48, %v600_v47  ;;  %v641_v55 = vmul.f32 0.70710677, %v1688_v49  ;;  %v609_v44 = vmul.f32 0.5, %v1688_v49 }
 0x105   : > { %v1463_v56 = vpop.eup %1462  ;;  %v699_v58 = vadd.f32 1.0, %v1461_v53  ;;  %v640_v60 = vmul.f32 0.70710677, %v1693_v52  ;;  %v1350_v61 = vpop.f32.mrb[16].mxu0  ;;  %v608_v41 = vmul.f32 0.5, %v1693_v52 }
 0x106   : > { %v698_v63 = vadd.f32 1.0, %v1463_v56  ;;  %1472 = verf.f32 %v641_v55  ;;  %v1700_v59 = vadd.f32 %v1350_v61, %v1646_v39  ;;  %v515_v0 = vpop.f32.mrb[17].mxu0  ;;  %1389 = vmatprep.mubr.msk.f32.mxu1 %vm765_vm2, %v728_v54 }
 0x107   : > { %1474 = verf.f32 %v640_v60  ;;  %v1705_v2 = vadd.f32 %v1646_v39, %v515_v0  ;;  %1390 = vmatmul.mubr.msk.f32.gmra.mrb[6].mxu1 %vm765_vm2, %v729_v57  ;;  %v731_v8 = vmul.f32 %v699_v58, %v603_v1 }
 0x108   : > { %v1465_v3 = vpop.eup %1464  ;;  %v730_v4 = vmul.f32 %v698_v63, %v602_v62  ;;  %v643_v6 = vmul.f32 0.70710677, %v1700_v59  ;;  %v611_v58 = vmul.f32 0.5, %v1700_v59 }
 0x109   : > { %v1467_v7 = vpop.eup %1466  ;;  %v701_v9 = vadd.f32 1.0, %v1465_v3  ;;  %v642_v10 = vmul.f32 0.70710677, %v1705_v2  ;;  %v1353_v11 = vpop.f32.mrb[18].mxu0  ;;  %v610_v55 = vmul.f32 0.5, %v1705_v2 }
 0x10a   : > { %v700_v13 = vadd.f32 1.0, %v1467_v7  ;;  %1476 = verf.f32 %v643_v6  ;;  %v1712_v5 = vadd.f32 %v1353_v11, %v1646_v39  ;;  %v525_v14 = vpop.f32.mrb[19].mxu0  ;;  %1392 = vmatprep.mubr.msk.f32.mxu1 %vm765_vm2, %v730_v4 }
 0x10b   : > { %1478 = verf.f32 %v642_v10  ;;  %v1717_v16 = vadd.f32 %v1646_v39, %v525_v14  ;;  %1393 = vmatmul.mubr.msk.f32.gmra.mrb[8].mxu1 %vm765_vm2, %v731_v8  ;;  %v733_v22 = vmul.f32 %v701_v9, %v605_v15 }
 0x10c   : > { %v1469_v17 = vpop.eup %1468  ;;  %v732_v18 = vmul.f32 %v700_v13, %v604_v12  ;;  %v645_v19 = vmul.f32 0.70710677, %v1712_v5  ;;  %v613_v9 = vmul.f32 0.5, %v1712_v5 }
 0x10d   : > { %v1471_v21 = vpop.eup %1470  ;;  %v703_v23 = vadd.f32 1.0, %v1469_v17  ;;  %v644_v24 = vmul.f32 0.70710677, %v1717_v16  ;;  %v1356_v25 = vpop.f32.mrb[20].mxu0  ;;  %v612_v6 = vmul.f32 0.5, %v1717_v16 }
 0x10e   : > { %v702_v27 = vadd.f32 1.0, %v1471_v21  ;;  %1480 = verf.f32 %v645_v19  ;;  %v1724_v20 = vadd.f32 %v1356_v25, %v1646_v39  ;;  %v535_v28 = vpop.f32.mrb[21].mxu0  ;;  %1395 = vmatprep.mubr.msk.f32.mxu1 %vm765_vm2, %v732_v18 }
 0x10f   : > { %1482 = verf.f32 %v644_v24  ;;  %v1729_v30 = vadd.f32 %v1646_v39, %v535_v28  ;;  %1396 = vmatmul.mubr.msk.f32.gmra.mrb[10].mxu1 %vm765_vm2, %v733_v22  ;;  %v735_v36 = vmul.f32 %v703_v23, %v607_v29 }
 0x110   : > { %v1473_v31 = vpop.eup %1472  ;;  %v734_v32 = vmul.f32 %v702_v27, %v606_v26  ;;  %v647_v33 = vmul.f32 0.70710677, %v1724_v20  ;;  %v615_v23 = vmul.f32 0.5, %v1724_v20 }
 0x111   : > { %v1475_v35 = vpop.eup %1474  ;;  %v705_v37 = vadd.f32 1.0, %v1473_v31  ;;  %v646_v38 = vmul.f32 0.70710677, %v1729_v30  ;;  %v1359_v40 = vpop.f32.mrb[22].mxu0  ;;  %v614_v19 = vmul.f32 0.5, %v1729_v30 }
 0x112   : > { %v704_v42 = vadd.f32 1.0, %v1475_v35  ;;  %1484 = verf.f32 %v647_v33  ;;  %v1736_v34 = vadd.f32 %v1359_v40, %v1646_v39  ;;  %v545_v43 = vpop.f32.mrb[23].mxu0  ;;  %1398 = vmatprep.mubr.msk.f32.mxu1 %vm765_vm2, %v734_v32 }
 0x113   : > { %1486 = verf.f32 %v646_v38  ;;  %v1741_v45 = vadd.f32 %v1646_v39, %v545_v43  ;;  %1399 = vmatmul.mubr.msk.f32.gmra.mrb[12].mxu1 %vm765_vm2, %v735_v36  ;;  %v737_v51 = vmul.f32 %v705_v37, %v609_v44 }
 0x114   : > { %v1477_v46 = vpop.eup %1476  ;;  %v736_v47 = vmul.f32 %v704_v42, %v608_v41  ;;  %v649_v48 = vmul.f32 0.70710677, %v1736_v34  ;;  %v617_v37 = vmul.f32 0.5, %v1736_v34 }
 0x115   : > { %v1479_v50 = vpop.eup %1478  ;;  %v707_v52 = vadd.f32 1.0, %v1477_v46  ;;  %v648_v53 = vmul.f32 0.70710677, %v1741_v45  ;;  %v1362_v54 = vpop.f32.mrb[24].mxu0  ;;  %v616_v33 = vmul.f32 0.5, %v1741_v45 }
 0x116   : > { %v706_v56 = vadd.f32 1.0, %v1479_v50  ;;  %1488 = verf.f32 %v649_v48  ;;  %v1748_v49 = vadd.f32 %v1362_v54, %v1646_v39  ;;  %v555_v57 = vpop.f32.mrb[25].mxu0  ;;  %1401 = vmatprep.mubr.msk.f32.mxu1 %vm765_vm2, %v736_v47 }
 0x117   : > { %1490 = verf.f32 %v648_v53  ;;  %v556_v60 = vadd.f32 %v1646_v39, %v555_v57  ;;  %1402 = vmatmul.mubr.msk.f32.gmra.mrb[14].mxu1 %vm765_vm2, %v737_v51  ;;  %v739_v1 = vmul.f32 %v707_v52, %v611_v58 }
 0x118   : > { %v1481_v61 = vpop.eup %1480  ;;  %v738_v62 = vmul.f32 %v706_v56, %v610_v55  ;;  %v651_v63 = vmul.f32 0.70710677, %v1748_v49  ;;  %v619_v50 = vmul.f32 0.5, %v1748_v49 }
 0x119   : > { %v1483_v0 = vpop.eup %1482  ;;  %v709_v2 = vadd.f32 1.0, %v1481_v61  ;;  %v650_v3 = vmul.f32 0.70710677, %v556_v60  ;;  %v1365_v4 = vpop.f32.mrb[26].mxu0  ;;  %v618_v47 = vmul.f32 0.5, %v556_v60 }
 0x11a   : > { %v708_v7 = vadd.f32 1.0, %v1483_v0  ;;  %1492 = verf.f32 %v651_v63  ;;  %v1757_v59 = vadd.f32 %v1365_v4, %v1646_v39  ;;  %v565_v8 = vpop.f32.mrb[27].mxu0  ;;  %1404 = vmatprep.mubr.msk.f32.mxu1 %vm765_vm2, %v738_v62 }
 0x11b   : > { %1494 = verf.f32 %v650_v3  ;;  %v566_v10 = vadd.f32 %v1646_v39, %v565_v8  ;;  %1405 = vmatmul.mubr.msk.f32.gmra.mrb[16].mxu1 %vm765_vm2, %v739_v1  ;;  %v741_v15 = vmul.f32 %v709_v2, %v613_v9 }
 0x11c   : > { %v1485_v11 = vpop.eup %1484  ;;  %v740_v12 = vmul.f32 %v708_v7, %v612_v6  ;;  %v653_v13 = vmul.f32 0.70710677, %v1757_v59  ;;  %v621_v56 = vmul.f32 0.5, %v1757_v59 }
 0x11d   : > { %v1487_v14 = vpop.eup %1486  ;;  %v711_v16 = vadd.f32 1.0, %v1485_v11  ;;  %v652_v17 = vmul.f32 0.70710677, %v566_v10  ;;  %v1368_v18 = vpop.f32.mrb[28].mxu0  ;;  %v620_v54 = vmul.f32 0.5, %v566_v10 }
 0x11e   : > { %v710_v21 = vadd.f32 1.0, %v1487_v14  ;;  %1496 = verf.f32 %v653_v13  ;;  %v581_v5 = vadd.f32 %v1368_v18, %v1646_v39  ;;  %v575_v22 = vpop.f32.mrb[29].mxu0  ;;  %1407 = vmatprep.mubr.msk.f32.mxu1 %vm765_vm2, %v740_v12  ;;  %v1791_v11 = vld [vmem:[%s1903_s4] ss:$0 sm:$0xff] }
 0x11f   : > { %1498 = verf.f32 %v652_v17  ;;  %v576_v24 = vadd.f32 %v1646_v39, %v575_v22  ;;  %1408 = vmatmul.mubr.msk.f32.gmra.mrb[18].mxu1 %vm765_vm2, %v741_v15  ;;  %v743_v29 = vmul.f32 %v711_v16, %v615_v23 }
 0x120   : > { %v1489_v25 = vpop.eup %1488  ;;  %v742_v26 = vmul.f32 %v710_v21, %v614_v19  ;;  %v655_v27 = vmul.f32 0.70710677, %v581_v5  ;;  %v623_v0 = vmul.f32 0.5, %v581_v5 }
 0x121   : > { %v1491_v28 = vpop.eup %1490  ;;  %v713_v30 = vadd.f32 1.0, %v1489_v25  ;;  %v654_v31 = vmul.f32 0.70710677, %v576_v24  ;;  %v1371_v32 = vpop.f32.mrb[30].mxu0  ;;  %v622_v62 = vmul.f32 0.5, %v576_v24 }
 0x122   : > { %v712_v35 = vadd.f32 1.0, %v1491_v28  ;;  %1500 = verf.f32 %v655_v27  ;;  %v591_v36 = vadd.f32 %v1371_v32, %v1646_v39  ;;  %v585_v20 = vpop.f32.mrb[31].mxu0  ;;  %1410 = vmatprep.mubr.msk.f32.mxu1 %vm765_vm2, %v742_v26 }
 0x123   : > { %1502 = verf.f32 %v654_v31  ;;  %v586_v38 = vadd.f32 %v1646_v39, %v585_v20  ;;  %1411 = vmatmul.mubr.msk.f32.gmra.mrb[20].mxu1 %vm765_vm2, %v743_v29  ;;  %v745_v44 = vmul.f32 %v713_v30, %v617_v37 }
 0x124   : > { %v1493_v40 = vpop.eup %1492  ;;  %v744_v41 = vmul.f32 %v712_v35, %v616_v33  ;;  %v657_v42 = vmul.f32 0.70710677, %v591_v36  ;;  %v625_v8 = vmul.f32 0.5, %v591_v36 }
 0x125   : > { %v1495_v43 = vpop.eup %1494  ;;  %v715_v45 = vadd.f32 1.0, %v1493_v40  ;;  %v656_v46 = vmul.f32 0.70710677, %v586_v38  ;;  %v624_v7 = vmul.f32 0.5, %v586_v38 }
 0x126   : > { %v714_v48 = vadd.f32 1.0, %v1495_v43  ;;  %1504 = verf.f32 %v657_v42  ;;  %1413 = vmatprep.mubr.msk.f32.mxu1 %vm765_vm2, %v744_v41 }
 0x127   : > { %1506 = verf.f32 %v656_v46  ;;  %1414 = vmatmul.mubr.msk.f32.gmra.mrb[22].mxu1 %vm765_vm2, %v745_v44  ;;  %v747_v52 = vmul.f32 %v715_v45, %v619_v50 }
 0x128   : > { %v1497_v39 = vpop.eup %1496  ;;  %v746_v34 = vmul.f32 %v714_v48, %v618_v47 }
 0x129   : > { %v1499_v51 = vpop.eup %1498  ;;  %v717_v53 = vadd.f32 1.0, %v1497_v39 }
 0x12a   : > { %v716_v55 = vadd.f32 1.0, %v1499_v51  ;;  %1416 = vmatprep.mubr.msk.f32.mxu1 %vm765_vm2, %v746_v34 }
 0x12b   : > { %1417 = vmatmul.mubr.msk.f32.gmra.mrb[24].mxu1 %vm765_vm2, %v747_v52  ;;  %v749_v49 = vmul.f32 %v717_v53, %v621_v56 }
 0x12c   : > { %v1501_v57 = vpop.eup %1500  ;;  %v748_v58 = vmul.f32 %v716_v55, %v620_v54 }
 0x12d   : > { %v1503_v60 = vpop.eup %1502  ;;  %v719_v61 = vadd.f32 1.0, %v1501_v57 }
 0x12e   : > { %v718_v63 = vadd.f32 1.0, %v1503_v60  ;;  %1419 = vmatprep.mubr.msk.f32.mxu1 %vm765_vm2, %v748_v58 }
 0x12f   : > { %1420 = vmatmul.mubr.msk.f32.gmra.mrb[26].mxu1 %vm765_vm2, %v749_v49  ;;  %v751_v4 = vmul.f32 %v719_v61, %v623_v0 }
 0x130   : > { %v1505_v1 = vpop.eup %1504  ;;  %v750_v2 = vmul.f32 %v718_v63, %v622_v62 }
 0x131   : > { %v1507_v3 = vpop.eup %1506  ;;  %v721_v6 = vadd.f32 1.0, %v1505_v1 }
 0x132   : > { %v720_v59 = vadd.f32 1.0, %v1507_v3  ;;  %1422 = vmatprep.mubr.msk.f32.mxu1 %vm765_vm2, %v750_v2 }
 0x133   : > { %1423 = vmatmul.mubr.msk.f32.gmra.mrb[28].mxu1 %vm765_vm2, %v751_v4  ;;  %v753_v10 = vmul.f32 %v721_v6, %v625_v8 }
 0x134   : > { %v752_v9 = vmul.f32 %v720_v59, %v624_v7 }
 0x136   : > { %1425 = vmatprep.mubr.msk.f32.mxu1 %vm765_vm2, %v752_v9 }
 0x137   : > { %1426 = vmatmul.mubr.msk.f32.gmra.mrb[30].mxu1 %vm765_vm2, %v753_v10 }
 0x1ce   : > { %v1382_v12 = vpop.f32.mrb[0].mxu1 }
 0x1cf   : > { %v934_v13 = vadd.f32 %v1382_v12, %v1791_v11  ;;  %v928_v14 = vpop.f32.mrb[1].mxu1 }
 0x1d0   : > { %v929_v15 = vadd.f32 %v1791_v11, %v928_v14 }
 0x1d1   : > { %1088 = vst.msk [vmem:[%s1798_s16 + $0x8] sm:$0xff] %vm268_vm1, %v934_v13 }
 0x1d2   : > { %1087 = vst.msk [vmem:[%s1798_s16] sm:$0xff] %vm268_vm1, %v929_v15  ;;  %v1385_v16 = vpop.f32.mrb[2].mxu1 }
 0x1d3   : > { %v944_v17 = vadd.f32 %v1385_v16, %v1791_v11  ;;  %v938_v18 = vpop.f32.mrb[3].mxu1 }
 0x1d4   : > { %v939_v19 = vadd.f32 %v1791_v11, %v938_v18 }
 0x1d5   : > { %1090 = vst.msk [vmem:[%s1798_s16 + $0x18] sm:$0xff] %vm268_vm1, %v944_v17 }
 0x1d6   : > { %1089 = vst.msk [vmem:[%s1798_s16 + $0x10] sm:$0xff] %vm268_vm1, %v939_v19  ;;  %v1388_v21 = vpop.f32.mrb[4].mxu1 }
 0x1d7   : > { %v954_v5 = vadd.f32 %v1388_v21, %v1791_v11  ;;  %v948_v22 = vpop.f32.mrb[5].mxu1 }
 0x1d8   : > { %v949_v23 = vadd.f32 %v1791_v11, %v948_v22 }
 0x1d9   : > { %1092 = vst.msk [vmem:[%s1798_s16 + $0x28] sm:$0xff] %vm268_vm1, %v954_v5 }
 0x1da   : > { %1091 = vst.msk [vmem:[%s1798_s16 + $0x20] sm:$0xff] %vm268_vm1, %v949_v23  ;;  %v1391_v24 = vpop.f32.mrb[6].mxu1 }
 0x1db   : > { %v964_v25 = vadd.f32 %v1391_v24, %v1791_v11  ;;  %v958_v26 = vpop.f32.mrb[7].mxu1 }
 0x1dc   : > { %v959_v27 = vadd.f32 %v1791_v11, %v958_v26 }
 0x1dd   : > { %1094 = vst.msk [vmem:[%s1798_s16 + $0x38] sm:$0xff] %vm268_vm1, %v964_v25 }
 0x1de   : > { %1093 = vst.msk [vmem:[%s1798_s16 + $0x30] sm:$0xff] %vm268_vm1, %v959_v27  ;;  %v1394_v28 = vpop.f32.mrb[8].mxu1 }
 0x1df   : > { %v974_v29 = vadd.f32 %v1394_v28, %v1791_v11  ;;  %v968_v30 = vpop.f32.mrb[9].mxu1 }
 0x1e0   : > { %v969_v31 = vadd.f32 %v1791_v11, %v968_v30 }
 0x1e1   : > { %1096 = vst.msk [vmem:[%s1798_s16 + $0x48] sm:$0xff] %vm268_vm1, %v974_v29 }
 0x1e2   : > { %1095 = vst.msk [vmem:[%s1798_s16 + $0x40] sm:$0xff] %vm268_vm1, %v969_v31  ;;  %v1397_v32 = vpop.f32.mrb[10].mxu1 }
 0x1e3   : > { %v984_v33 = vadd.f32 %v1397_v32, %v1791_v11  ;;  %v978_v35 = vpop.f32.mrb[11].mxu1 }
 0x1e4   : > { %v979_v36 = vadd.f32 %v1791_v11, %v978_v35 }
 0x1e5   : > { %1098 = vst.msk [vmem:[%s1798_s16 + $0x58] sm:$0xff] %vm268_vm1, %v984_v33 }
 0x1e6   : > { %1097 = vst.msk [vmem:[%s1798_s16 + $0x50] sm:$0xff] %vm268_vm1, %v979_v36  ;;  %v1400_v20 = vpop.f32.mrb[12].mxu1 }
 0x1e7   : > { %v994_v37 = vadd.f32 %v1400_v20, %v1791_v11  ;;  %v988_v38 = vpop.f32.mrb[13].mxu1 }
 0x1e8   : > { %v989_v40 = vadd.f32 %v1791_v11, %v988_v38 }
 0x1e9   : > { %1100 = vst.msk [vmem:[%s1798_s16 + $0x68] sm:$0xff] %vm268_vm1, %v994_v37 }
 0x1ea   : > { %1099 = vst.msk [vmem:[%s1798_s16 + $0x60] sm:$0xff] %vm268_vm1, %v989_v40  ;;  %v1403_v41 = vpop.f32.mrb[14].mxu1 }
 0x1eb   : > { %v1004_v42 = vadd.f32 %v1403_v41, %v1791_v11  ;;  %v998_v43 = vpop.f32.mrb[15].mxu1 }
 0x1ec   : > { %v999_v44 = vadd.f32 %v1791_v11, %v998_v43 }
 0x1ed   : > { %1102 = vst.msk [vmem:[%s1798_s16 + $0x78] sm:$0xff] %vm268_vm1, %v1004_v42 }
 0x1ee   : > { %1101 = vst.msk [vmem:[%s1798_s16 + $0x70] sm:$0xff] %vm268_vm1, %v999_v44  ;;  %v1406_v45 = vpop.f32.mrb[16].mxu1 }
 0x1ef   : > { %v1014_v46 = vadd.f32 %v1406_v45, %v1791_v11  ;;  %v1008_v47 = vpop.f32.mrb[17].mxu1 }
 0x1f0   : > { %v1009_v48 = vadd.f32 %v1791_v11, %v1008_v47 }
 0x1f1   : > { %1104 = vst.msk [vmem:[%s1798_s16 + $0x88] sm:$0xff] %vm268_vm1, %v1014_v46 }
 0x1f2   : > { %1103 = vst.msk [vmem:[%s1798_s16 + $0x80] sm:$0xff] %vm268_vm1, %v1009_v48  ;;  %v1409_v50 = vpop.f32.mrb[18].mxu1 }
 0x1f3   : > { %v1024_v39 = vadd.f32 %v1409_v50, %v1791_v11  ;;  %v1018_v34 = vpop.f32.mrb[19].mxu1 }
 0x1f4   : > { %v1019_v51 = vadd.f32 %v1791_v11, %v1018_v34 }
 0x1f5   : > { %1106 = vst.msk [vmem:[%s1798_s16 + $0x98] sm:$0xff] %vm268_vm1, %v1024_v39 }
 0x1f6   : > { %1105 = vst.msk [vmem:[%s1798_s16 + $0x90] sm:$0xff] %vm268_vm1, %v1019_v51  ;;  %v1412_v52 = vpop.f32.mrb[20].mxu1 }
 0x1f7   : > { %v1034_v53 = vadd.f32 %v1412_v52, %v1791_v11  ;;  %v1028_v54 = vpop.f32.mrb[21].mxu1 }
 0x1f8   : > { %v1029_v55 = vadd.f32 %v1791_v11, %v1028_v54 }
 0x1f9   : > { %1108 = vst.msk [vmem:[%s1798_s16 + $0xa8] sm:$0xff] %vm268_vm1, %v1034_v53 }
 0x1fa   : > { %1107 = vst.msk [vmem:[%s1798_s16 + $0xa0] sm:$0xff] %vm268_vm1, %v1029_v55  ;;  %v1415_v56 = vpop.f32.mrb[22].mxu1 }
 0x1fb   : > { %v1044_v57 = vadd.f32 %v1415_v56, %v1791_v11  ;;  %v1038_v58 = vpop.f32.mrb[23].mxu1 }
 0x1fc   : > { %v1039_v60 = vadd.f32 %v1791_v11, %v1038_v58 }
 0x1fd   : > { %1110 = vst.msk [vmem:[%s1798_s16 + $0xb8] sm:$0xff] %vm268_vm1, %v1044_v57 }
 0x1fe   : > { %1109 = vst.msk [vmem:[%s1798_s16 + $0xb0] sm:$0xff] %vm268_vm1, %v1039_v60  ;;  %v1418_v49 = vpop.f32.mrb[24].mxu1 }
 0x1ff   : > { %v1054_v61 = vadd.f32 %v1418_v49, %v1791_v11  ;;  %v1048_v62 = vpop.f32.mrb[25].mxu1 }
 0x200   : > { %v1049_v63 = vadd.f32 %v1791_v11, %v1048_v62 }
 0x201   : > { %1112 = vst.msk [vmem:[%s1798_s16 + $0xc8] sm:$0xff] %vm268_vm1, %v1054_v61 }
 0x202   : > { %1111 = vst.msk [vmem:[%s1798_s16 + $0xc0] sm:$0xff] %vm268_vm1, %v1049_v63  ;;  %v1421_v0 = vpop.f32.mrb[26].mxu1 }
 0x203   : > { %v1064_v1 = vadd.f32 %v1421_v0, %v1791_v11  ;;  %v1058_v2 = vpop.f32.mrb[27].mxu1 }
 0x204   : > { %v1059_v3 = vadd.f32 %v1791_v11, %v1058_v2 }
 0x205   : > { %1114 = vst.msk [vmem:[%s1798_s16 + $0xd8] sm:$0xff] %vm268_vm1, %v1064_v1 }
 0x206   : > { %1113 = vst.msk [vmem:[%s1798_s16 + $0xd0] sm:$0xff] %vm268_vm1, %v1059_v3  ;;  %v1424_v4 = vpop.f32.mrb[28].mxu1 }
 0x207   : > { %v1074_v6 = vadd.f32 %v1424_v4, %v1791_v11  ;;  %v1068_v7 = vpop.f32.mrb[29].mxu1 }
 0x208   : > { %v1069_v59 = vadd.f32 %v1791_v11, %v1068_v7 }
 0x209   : > { %1116 = vst.msk [vmem:[%s1798_s16 + $0xe8] sm:$0xff] %vm268_vm1, %v1074_v6 }
 0x20a   : > { %1115 = vst.msk [vmem:[%s1798_s16 + $0xe0] sm:$0xff] %vm268_vm1, %v1069_v59  ;;  %v1427_v8 = vpop.f32.mrb[30].mxu1 }
 0x20b   : > { %v1084_v9 = vadd.f32 %v1427_v8, %v1791_v11  ;;  %v1078_v10 = vpop.f32.mrb[31].mxu1 }
 0x20c   : > { %v1079_v12 = vadd.f32 %v1791_v11, %v1078_v10 }
 0x20d   : > { %1118 = vst.msk [vmem:[%s1798_s16 + $0xf8] sm:$0xff] %vm268_vm1, %v1084_v9 }
 0x20e   : > { %1117 = vst.msk [vmem:[%s1798_s16 + $0xf0] sm:$0xff] %vm268_vm1, %v1079_v12 }
 0x20f PF: > { %s15_s18 = sadd.s32 1, %s1514_s18  }
 0x210   : > { %p12_p4 = scmp.ge.s32.totalorder %s15_s18, 4  }
 0x212   :  { %14 = sbr.rel (!%p12_p4) target bundleno = 1 (0x1), region = 70 }

// kernel: tpu_custom_call.1
= control target key start
LH: loop header
LB: loop body
LE: loop exit
PB: predicated region body
PF: predicated region fallthrough
CT: control target
= control target key end

     0   :  { %s1546_s18 = smov 0   ;;  %s1899_s0 = inlined_call_operand.vmem [shape: f32[512,4], index: 0, kind: input, shape index: {}]   ;;  %s1900_s1 = inlined_call_operand.vmem [shape: f32[4,32], index: 1, kind: input, shape index: {}]   ;;  %s1901_s2 = inlined_call_operand.vmem [shape: f32[1,32], index: 2, kind: input, shape index: {}]   ;;  %s1902_s3 = inlined_call_operand.vmem [shape: f32[32,4], index: 3, kind: input, shape index: {}]   ;;  %s1903_s4 = inlined_call_operand.vmem [shape: f32[1,4], index: 4, kind: input, shape index: {}]   ;;  %s1904_s5 = inlined_call_operand.vmem [shape: f32[512,4], index: 5, kind: output, shape index: {}]  }
   0x1 LB: > { %s1175_s19 = sadd.s32 4294967295, %s1514_s18   ;;  %p1179_p0 = scmp.ge.s32.totalorder %s1514_s18, 1  ;;  %s1514_s18 = sphi %s1546_s18, %s15_s18  }
   0x2   : > { %p188_p1 = scmp.lt.s32.totalorder %s1514_s18, 3 }
   0x4   : > { %p189_p2 = pnand %p1179_p0, %p188_p1 }
   0x5   : > { %v260_v0 = vld [vmem:[%s1900_s1] sm:$0xf] (!%p189_p2)  ;;  %vm365_vm0 = vcmask (!%p189_p2), 1043456   ;;  %s1180_s22 = sshll.u32 (!%p189_p2), %s1175_s19, 5  ;;  %vm268_vm1 = vcmask (!%p189_p2), 31744   ;;  %v755_v34 = vld [vmem:[%s1902_s3 + $0x8] sm:$0xff] (!%p189_p2) }
   0x6   : > { %192 = sbr.rel (%p189_p2) target bundleno = 527 (0x20f), region = 40  ;;  %1322 = vmatprep.subr.msk.mxu0 (!%p189_p2), %vm365_vm0, %v260_v0  ;;  %p217_p3 = scmp.lt.s32.totalorder (!%p189_p2), %s1180_s22, 63  ;;  %v754_v33 = vld [vmem:[%s1902_s3] sm:$0xff] (!%p189_p2)  ;;  %v756_v36 = vld [vmem:[%s1902_s3 + $0x10] sm:$0xff] (!%p189_p2)  ;;  %v757_v37 = vld [vmem:[%s1902_s3 + $0x18] sm:$0xff] (!%p189_p2)  ;;  %vm765_vm2 = vcmask (!%p189_p2), 261120  }
   0x7   : > { %1323 = vmatpush3.msk.msra.mxu0 (!%p189_p2), %vm365_vm0, %v260_v0  ;;  %v1428_v35 = vpack.c.bf16 (!%p189_p2), %v755_v34, %v754_v33  ;;  %v1432_v38 = vpack.c.bf16 (!%p189_p2), %v757_v37, %v756_v36  ;;  %v1646_v39 = vld [vmem:[%s1901_s2] ss:$0 sm:$0xff] (!%p189_p2) }
   0x9   : > { %1429 = vmatprep.subr.bf16.mxu1 (!%p189_p2), %v1428_v35 }
   0xa   : > { %1431 = vmatpush3.bf16.msra.mxu1 (!%p189_p2), %v1428_v35 }
   0xb   : > { %1433 = vmatprep.subr.bf16.mxu1 (!%p189_p2), %v1432_v38 }
   0xd   : > { %s1906_s22 = smov (!%p217_p3, %s1180_s22), 63 }
   0xe   : > { %s1181_s23 = sshll.u32 %s1906_s22, 3  ;;  %1435 = vmatpush3.bf16.msra.mxu1 %v1432_v38 }
   0xf   : > { %s1565_s26 = scalar_lea.vmem %s1899_s0, %s1181_s23  ;;  %s1798_s16 = scalar_lea.vmem %s1904_s5, %s1181_s23 }
  0x10   : > { %v228_v1 = vld [vmem:[%s1565_s26] sm:$0xff]  ;;  %v229_v2 = vld [vmem:[%s1565_s26 + $0x8] sm:$0xff]  ;;  %v230_v3 = vld [vmem:[%s1565_s26 + $0x10] sm:$0xff] }
  0x11   : > { %1324 = vmatprep.mubr.msk.f32.mxu0 %vm268_vm1, %v228_v1  ;;  %v231_v4 = vld [vmem:[%s1565_s26 + $0x18] sm:$0xff]  ;;  %v232_v5 = vld [vmem:[%s1565_s26 + $0x20] sm:$0xff]  ;;  %v233_v6 = vld [vmem:[%s1565_s26 + $0x28] sm:$0xff] }
  0x12   : > { %1325 = vmatmul.mubr.msk.f32.vlgmr.msra.gmra.mrb[0].mxu0 %vm268_vm1, %v229_v2  ;;  %v234_v7 = vld [vmem:[%s1565_s26 + $0x30] sm:$0xff]  ;;  %v235_v8 = vld [vmem:[%s1565_s26 + $0x38] sm:$0xff]  ;;  %v236_v9 = vld [vmem:[%s1565_s26 + $0x40] sm:$0xff] }
  0x13   : > { %1327 = vmatprep.mubr.msk.f32.mxu0 %vm268_vm1, %v230_v3  ;;  %v237_v10 = vld [vmem:[%s1565_s26 + $0x48] sm:$0xff]  ;;  %v238_v11 = vld [vmem:[%s1565_s26 + $0x50] sm:$0xff]  ;;  %v239_v12 = vld [vmem:[%s1565_s26 + $0x58] sm:$0xff] }
  0x14   : > { %v240_v13 = vld [vmem:[%s1565_s26 + $0x60] sm:$0xff]  ;;  %v241_v14 = vld [vmem:[%s1565_s26 + $0x68] sm:$0xff]  ;;  %v242_v15 = vld [vmem:[%s1565_s26 + $0x70] sm:$0xff] }
  0x15   : > { %v243_v16 = vld [vmem:[%s1565_s26 + $0x78] sm:$0xff]  ;;  %v244_v17 = vld [vmem:[%s1565_s26 + $0x80] sm:$0xff]  ;;  %v245_v18 = vld [vmem:[%s1565_s26 + $0x88] sm:$0xff] }
  0x16   : > { %1328 = vmatmul.mubr.msk.f32.gmra.mrb[2].mxu0 %vm268_vm1, %v231_v4  ;;  %v246_v19 = vld [vmem:[%s1565_s26 + $0x90] sm:$0xff]  ;;  %v247_v20 = vld [vmem:[%s1565_s26 + $0x98] sm:$0xff]  ;;  %v248_v21 = vld [vmem:[%s1565_s26 + $0xa0] sm:$0xff] }
  0x17   : > { %1330 = vmatprep.mubr.msk.f32.mxu0 %vm268_vm1, %v232_v5  ;;  %v249_v22 = vld [vmem:[%s1565_s26 + $0xa8] sm:$0xff]  ;;  %v250_v23 = vld [vmem:[%s1565_s26 + $0xb0] sm:$0xff]  ;;  %v251_v24 = vld [vmem:[%s1565_s26 + $0xb8] sm:$0xff] }
  0x18   : > { %v252_v25 = vld [vmem:[%s1565_s26 + $0xc0] sm:$0xff]  ;;  %v253_v26 = vld [vmem:[%s1565_s26 + $0xc8] sm:$0xff]  ;;  %v254_v27 = vld [vmem:[%s1565_s26 + $0xd0] sm:$0xff] }
  0x19   : > { %v255_v28 = vld [vmem:[%s1565_s26 + $0xd8] sm:$0xff]  ;;  %v256_v29 = vld [vmem:[%s1565_s26 + $0xe0] sm:$0xff]  ;;  %v257_v30 = vld [vmem:[%s1565_s26 + $0xe8] sm:$0xff] }
  0x1a   : > { %1331 = vmatmul.mubr.msk.f32.gmra.mrb[4].mxu0 %vm268_vm1, %v233_v6  ;;  %v258_v31 = vld [vmem:[%s1565_s26 + $0xf0] sm:$0xff]  ;;  %v259_v32 = vld [vmem:[%s1565_s26 + $0xf8] sm:$0xff] }
  0x1b   : > { %1333 = vmatprep.mubr.msk.f32.mxu0 %vm268_vm1, %v234_v7 }
  0x1e   : > { %1334 = vmatmul.mubr.msk.f32.gmra.mrb[6].mxu0 %vm268_vm1, %v235_v8 }
  0x1f   : > { %1336 = vmatprep.mubr.msk.f32.mxu0 %vm268_vm1, %v236_v9 }
  0x22   : > { %1337 = vmatmul.mubr.msk.f32.gmra.mrb[8].mxu0 %vm268_vm1, %v237_v10 }
  0x23   : > { %1339 = vmatprep.mubr.msk.f32.mxu0 %vm268_vm1, %v238_v11 }
  0x26   : > { %1340 = vmatmul.mubr.msk.f32.gmra.mrb[10].mxu0 %vm268_vm1, %v239_v12 }
  0x27   : > { %1342 = vmatprep.mubr.msk.f32.mxu0 %vm268_vm1, %v240_v13 }
  0x2a   : > { %1343 = vmatmul.mubr.msk.f32.gmra.mrb[12].mxu0 %vm268_vm1, %v241_v14 }
  0x2b   : > { %1345 = vmatprep.mubr.msk.f32.mxu0 %vm268_vm1, %v242_v15 }
  0x2e   : > { %1346 = vmatmul.mubr.msk.f32.gmra.mrb[14].mxu0 %vm268_vm1, %v243_v16 }
  0x2f   : > { %1348 = vmatprep.mubr.msk.f32.mxu0 %vm268_vm1, %v244_v17 }
  0x32   : > { %1349 = vmatmul.mubr.msk.f32.gmra.mrb[16].mxu0 %vm268_vm1, %v245_v18 }
  0x33   : > { %1351 = vmatprep.mubr.msk.f32.mxu0 %vm268_vm1, %v246_v19 }
  0x36   : > { %1352 = vmatmul.mubr.msk.f32.gmra.mrb[18].mxu0 %vm268_vm1, %v247_v20 }
  0x37   : > { %1354 = vmatprep.mubr.msk.f32.mxu0 %vm268_vm1, %v248_v21 }
  0x3a   : > { %1355 = vmatmul.mubr.msk.f32.gmra.mrb[20].mxu0 %vm268_vm1, %v249_v22 }
  0x3b   : > { %1357 = vmatprep.mubr.msk.f32.mxu0 %vm268_vm1, %v250_v23 }
  0x3e   : > { %1358 = vmatmul.mubr.msk.f32.gmra.mrb[22].mxu0 %vm268_vm1, %v251_v24 }
  0x3f   : > { %1360 = vmatprep.mubr.msk.f32.mxu0 %vm268_vm1, %v252_v25 }
  0x42   : > { %1361 = vmatmul.mubr.msk.f32.gmra.mrb[24].mxu0 %vm268_vm1, %v253_v26 }
  0x43   : > { %1363 = vmatprep.mubr.msk.f32.mxu0 %vm268_vm1, %v254_v27 }
  0x46   : > { %1364 = vmatmul.mubr.msk.f32.gmra.mrb[26].mxu0 %vm268_vm1, %v255_v28 }
  0x47   : > { %1366 = vmatprep.mubr.msk.f32.mxu0 %vm268_vm1, %v256_v29 }
  0x4a   : > { %1367 = vmatmul.mubr.msk.f32.gmra.mrb[28].mxu0 %vm268_vm1, %v257_v30 }
  0x4b   : > { %1369 = vmatprep.mubr.msk.f32.mxu0 %vm268_vm1, %v258_v31 }
  0x4e   : > { %1370 = vmatmul.mubr.msk.f32.gmra.mrb[30].mxu0 %vm268_vm1, %v259_v32 }
  0xe5   : > { %v1326_v40 = vpop.f32.mrb[0].mxu0 }
  0xe6   : > { %v441_v41 = vadd.f32 %v1326_v40, %v1646_v39  ;;  %v435_v42 = vpop.f32.mrb[1].mxu0 }
  0xe7   : > { %v436_v43 = vadd.f32 %v1646_v39, %v435_v42 }
  0xe8   : > { %v627_v44 = vmul.f32 0.70710677, %v441_v41  ;;  %v595_v8 = vmul.f32 0.5, %v441_v41 }
  0xe9   : > { %v626_v45 = vmul.f32 0.70710677, %v436_v43  ;;  %v1329_v46 = vpop.f32.mrb[2].mxu0  ;;  %v594_v4 = vmul.f32 0.5, %v436_v43 }
  0xea   : > { %1444 = verf.f32 %v627_v44  ;;  %v451_v47 = vadd.f32 %v1329_v46, %v1646_v39  ;;  %v445_v48 = vpop.f32.mrb[3].mxu0 }
  0xeb   : > { %1446 = verf.f32 %v626_v45  ;;  %v446_v49 = vadd.f32 %v1646_v39, %v445_v48 }
  0xec   : > { %v629_v50 = vmul.f32 0.70710677, %v451_v47  ;;  %v597_v22 = vmul.f32 0.5, %v451_v47 }
  0xed   : > { %v628_v51 = vmul.f32 0.70710677, %v446_v49  ;;  %v1332_v52 = vpop.f32.mrb[4].mxu0  ;;  %v596_v18 = vmul.f32 0.5, %v446_v49 }
  0xee   : > { %1448 = verf.f32 %v629_v50  ;;  %v461_v53 = vadd.f32 %v1332_v52, %v1646_v39  ;;  %v455_v54 = vpop.f32.mrb[5].mxu0 }
  0xef   : > { %1450 = verf.f32 %v628_v51  ;;  %v456_v55 = vadd.f32 %v1646_v39, %v455_v54 }
  0xf0   : > { %v631_v56 = vmul.f32 0.70710677, %v461_v53  ;;  %v599_v36 = vmul.f32 0.5, %v461_v53 }
  0xf1   : > { %v630_v57 = vmul.f32 0.70710677, %v456_v55  ;;  %v1335_v58 = vpop.f32.mrb[6].mxu0  ;;  %v598_v32 = vmul.f32 0.5, %v456_v55 }
  0xf2   : > { %1452 = verf.f32 %v631_v56  ;;  %v1655_v59 = vadd.f32 %v1335_v58, %v1646_v39  ;;  %v465_v60 = vpop.f32.mrb[7].mxu0 }
  0xf3   : > { %1454 = verf.f32 %v630_v57  ;;  %v466_v61 = vadd.f32 %v1646_v39, %v465_v60 }
  0xf4   : > { %v1445_v62 = vpop.eup %1444  ;;  %v633_v63 = vmul.f32 0.70710677, %v1655_v59  ;;  %v601_v51 = vmul.f32 0.5, %v1655_v59 }
  0xf5   : > { %v1447_v0 = vpop.eup %1446  ;;  %v691_v1 = vadd.f32 1.0, %v1445_v62  ;;  %v632_v2 = vmul.f32 0.70710677, %v466_v61  ;;  %v1338_v3 = vpop.f32.mrb[8].mxu0  ;;  %v600_v47 = vmul.f32 0.5, %v466_v61 }
  0xf6   : > { %1456 = verf.f32 %v633_v63  ;;  %v1660_v5 = vadd.f32 %v1338_v3, %v1646_v39  ;;  %v475_v6 = vpop.f32.mrb[9].mxu0  ;;  %v690_v7 = vadd.f32 1.0, %v1447_v0 }
  0xf7   : > { %1458 = verf.f32 %v632_v2  ;;  %v1663_v9 = vadd.f32 %v1646_v39, %v475_v6  ;;  %v723_v14 = vmul.f32 %v691_v1, %v595_v8 }
  0xf8   : > { %v1449_v10 = vpop.eup %1448  ;;  %v635_v11 = vmul.f32 0.70710677, %v1660_v5  ;;  %v722_v12 = vmul.f32 %v690_v7, %v594_v4  ;;  %v603_v1 = vmul.f32 0.5, %v1660_v5 }
  0xf9   : > { %v1451_v13 = vpop.eup %1450  ;;  %v693_v15 = vadd.f32 1.0, %v1449_v10  ;;  %v634_v16 = vmul.f32 0.70710677, %v1663_v9  ;;  %v1341_v17 = vpop.f32.mrb[10].mxu0  ;;  %v602_v62 = vmul.f32 0.5, %v1663_v9 }
  0xfa   : > { %v692_v19 = vadd.f32 1.0, %v1451_v13  ;;  %1460 = verf.f32 %v635_v11  ;;  %v1668_v20 = vadd.f32 %v1341_v17, %v1646_v39  ;;  %v485_v21 = vpop.f32.mrb[11].mxu0  ;;  %1380 = vmatprep.mubr.msk.f32.mxu1 %vm765_vm2, %v722_v12 }
  0xfb   : > { %1462 = verf.f32 %v634_v16  ;;  %v1672_v23 = vadd.f32 %v1646_v39, %v485_v21  ;;  %1381 = vmatmul.mubr.msk.f32.vlgmr.msra.gmra.mrb[0].mxu1 %vm765_vm2, %v723_v14  ;;  %v725_v28 = vmul.f32 %v693_v15, %v597_v22 }
  0xfc   : > { %v1453_v24 = vpop.eup %1452  ;;  %v724_v25 = vmul.f32 %v692_v19, %v596_v18  ;;  %v637_v26 = vmul.f32 0.70710677, %v1668_v20  ;;  %v605_v15 = vmul.f32 0.5, %v1668_v20 }
  0xfd   : > { %v1455_v27 = vpop.eup %1454  ;;  %v695_v29 = vadd.f32 1.0, %v1453_v24  ;;  %v636_v30 = vmul.f32 0.70710677, %v1672_v23  ;;  %v1344_v31 = vpop.f32.mrb[12].mxu0  ;;  %v604_v12 = vmul.f32 0.5, %v1672_v23 }
  0xfe   : > { %v694_v33 = vadd.f32 1.0, %v1455_v27  ;;  %1464 = verf.f32 %v637_v26  ;;  %v1678_v34 = vadd.f32 %v1344_v31, %v1646_v39  ;;  %v495_v35 = vpop.f32.mrb[13].mxu0  ;;  %1383 = vmatprep.mubr.msk.f32.mxu1 %vm765_vm2, %v724_v25 }
  0xff   : > { %1466 = verf.f32 %v636_v30  ;;  %v1682_v37 = vadd.f32 %v1646_v39, %v495_v35  ;;  %1384 = vmatmul.mubr.msk.f32.gmra.mrb[2].mxu1 %vm765_vm2, %v725_v28  ;;  %v727_v43 = vmul.f32 %v695_v29, %v599_v36 }
 0x100   : > { %v1457_v38 = vpop.eup %1456  ;;  %v726_v40 = vmul.f32 %v694_v33, %v598_v32  ;;  %v639_v41 = vmul.f32 0.70710677, %v1678_v34  ;;  %v607_v29 = vmul.f32 0.5, %v1678_v34 }
 0x101   : > { %v1459_v42 = vpop.eup %1458  ;;  %v697_v44 = vadd.f32 1.0, %v1457_v38  ;;  %v638_v45 = vmul.f32 0.70710677, %v1682_v37  ;;  %v1347_v46 = vpop.f32.mrb[14].mxu0  ;;  %v606_v26 = vmul.f32 0.5, %v1682_v37 }
 0x102   : > { %v696_v48 = vadd.f32 1.0, %v1459_v42  ;;  %1468 = verf.f32 %v639_v41  ;;  %v1688_v49 = vadd.f32 %v1347_v46, %v1646_v39  ;;  %v505_v50 = vpop.f32.mrb[15].mxu0  ;;  %1386 = vmatprep.mubr.msk.f32.mxu1 %vm765_vm2, %v726_v40 }
 0x103   : > { %1470 = verf.f32 %v638_v45  ;;  %v1693_v52 = vadd.f32 %v1646_v39, %v505_v50  ;;  %1387 = vmatmul.mubr.msk.f32.gmra.mrb[4].mxu1 %vm765_vm2, %v727_v43  ;;  %v729_v57 = vmul.f32 %v697_v44, %v601_v51 }
 0x104   : > { %v1461_v53 = vpop.eup %1460  ;;  %v728_v54 = vmul.f32 %v696_v48, %v600_v47  ;;  %v641_v55 = vmul.f32 0.70710677, %v1688_v49  ;;  %v609_v44 = vmul.f32 0.5, %v1688_v49 }
 0x105   : > { %v1463_v56 = vpop.eup %1462  ;;  %v699_v58 = vadd.f32 1.0, %v1461_v53  ;;  %v640_v60 = vmul.f32 0.70710677, %v1693_v52  ;;  %v1350_v61 = vpop.f32.mrb[16].mxu0  ;;  %v608_v41 = vmul.f32 0.5, %v1693_v52 }
 0x106   : > { %v698_v63 = vadd.f32 1.0, %v1463_v56  ;;  %1472 = verf.f32 %v641_v55  ;;  %v1700_v59 = vadd.f32 %v1350_v61, %v1646_v39  ;;  %v515_v0 = vpop.f32.mrb[17].mxu0  ;;  %1389 = vmatprep.mubr.msk.f32.mxu1 %vm765_vm2, %v728_v54 }
 0x107   : > { %1474 = verf.f32 %v640_v60  ;;  %v1705_v2 = vadd.f32 %v1646_v39, %v515_v0  ;;  %1390 = vmatmul.mubr.msk.f32.gmra.mrb[6].mxu1 %vm765_vm2, %v729_v57  ;;  %v731_v8 = vmul.f32 %v699_v58, %v603_v1 }
 0x108   : > { %v1465_v3 = vpop.eup %1464  ;;  %v730_v4 = vmul.f32 %v698_v63, %v602_v62  ;;  %v643_v6 = vmul.f32 0.70710677, %v1700_v59  ;;  %v611_v58 = vmul.f32 0.5, %v1700_v59 }
 0x109   : > { %v1467_v7 = vpop.eup %1466  ;;  %v701_v9 = vadd.f32 1.0, %v1465_v3  ;;  %v642_v10 = vmul.f32 0.70710677, %v1705_v2  ;;  %v1353_v11 = vpop.f32.mrb[18].mxu0  ;;  %v610_v55 = vmul.f32 0.5, %v1705_v2 }
 0x10a   : > { %v700_v13 = vadd.f32 1.0, %v1467_v7  ;;  %1476 = verf.f32 %v643_v6  ;;  %v1712_v5 = vadd.f32 %v1353_v11, %v1646_v39  ;;  %v525_v14 = vpop.f32.mrb[19].mxu0  ;;  %1392 = vmatprep.mubr.msk.f32.mxu1 %vm765_vm2, %v730_v4 }
 0x10b   : > { %1478 = verf.f32 %v642_v10  ;;  %v1717_v16 = vadd.f32 %v1646_v39, %v525_v14  ;;  %1393 = vmatmul.mubr.msk.f32.gmra.mrb[8].mxu1 %vm765_vm2, %v731_v8  ;;  %v733_v22 = vmul.f32 %v701_v9, %v605_v15 }
 0x10c   : > { %v1469_v17 = vpop.eup %1468  ;;  %v732_v18 = vmul.f32 %v700_v13, %v604_v12  ;;  %v645_v19 = vmul.f32 0.70710677, %v1712_v5  ;;  %v613_v9 = vmul.f32 0.5, %v1712_v5 }
 0x10d   : > { %v1471_v21 = vpop.eup %1470  ;;  %v703_v23 = vadd.f32 1.0, %v1469_v17  ;;  %v644_v24 = vmul.f32 0.70710677, %v1717_v16  ;;  %v1356_v25 = vpop.f32.mrb[20].mxu0  ;;  %v612_v6 = vmul.f32 0.5, %v1717_v16 }
 0x10e   : > { %v702_v27 = vadd.f32 1.0, %v1471_v21  ;;  %1480 = verf.f32 %v645_v19  ;;  %v1724_v20 = vadd.f32 %v1356_v25, %v1646_v39  ;;  %v535_v28 = vpop.f32.mrb[21].mxu0  ;;  %1395 = vmatprep.mubr.msk.f32.mxu1 %vm765_vm2, %v732_v18 }
 0x10f   : > { %1482 = verf.f32 %v644_v24  ;;  %v1729_v30 = vadd.f32 %v1646_v39, %v535_v28  ;;  %1396 = vmatmul.mubr.msk.f32.gmra.mrb[10].mxu1 %vm765_vm2, %v733_v22  ;;  %v735_v36 = vmul.f32 %v703_v23, %v607_v29 }
 0x110   : > { %v1473_v31 = vpop.eup %1472  ;;  %v734_v32 = vmul.f32 %v702_v27, %v606_v26  ;;  %v647_v33 = vmul.f32 0.70710677, %v1724_v20  ;;  %v615_v23 = vmul.f32 0.5, %v1724_v20 }
 0x111   : > { %v1475_v35 = vpop.eup %1474  ;;  %v705_v37 = vadd.f32 1.0, %v1473_v31  ;;  %v646_v38 = vmul.f32 0.70710677, %v1729_v30  ;;  %v1359_v40 = vpop.f32.mrb[22].mxu0  ;;  %v614_v19 = vmul.f32 0.5, %v1729_v30 }
 0x112   : > { %v704_v42 = vadd.f32 1.0, %v1475_v35  ;;  %1484 = verf.f32 %v647_v33  ;;  %v1736_v34 = vadd.f32 %v1359_v40, %v1646_v39  ;;  %v545_v43 = vpop.f32.mrb[23].mxu0  ;;  %1398 = vmatprep.mubr.msk.f32.mxu1 %vm765_vm2, %v734_v32 }
 0x113   : > { %1486 = verf.f32 %v646_v38  ;;  %v1741_v45 = vadd.f32 %v1646_v39, %v545_v43  ;;  %1399 = vmatmul.mubr.msk.f32.gmra.mrb[12].mxu1 %vm765_vm2, %v735_v36  ;;  %v737_v51 = vmul.f32 %v705_v37, %v609_v44 }
 0x114   : > { %v1477_v46 = vpop.eup %1476  ;;  %v736_v47 = vmul.f32 %v704_v42, %v608_v41  ;;  %v649_v48 = vmul.f32 0.70710677, %v1736_v34  ;;  %v617_v37 = vmul.f32 0.5, %v1736_v34 }
 0x115   : > { %v1479_v50 = vpop.eup %1478  ;;  %v707_v52 = vadd.f32 1.0, %v1477_v46  ;;  %v648_v53 = vmul.f32 0.70710677, %v1741_v45  ;;  %v1362_v54 = vpop.f32.mrb[24].mxu0  ;;  %v616_v33 = vmul.f32 0.5, %v1741_v45 }
 0x116   : > { %v706_v56 = vadd.f32 1.0, %v1479_v50  ;;  %1488 = verf.f32 %v649_v48  ;;  %v1748_v49 = vadd.f32 %v1362_v54, %v1646_v39  ;;  %v555_v57 = vpop.f32.mrb[25].mxu0  ;;  %1401 = vmatprep.mubr.msk.f32.mxu1 %vm765_vm2, %v736_v47 }
 0x117   : > { %1490 = verf.f32 %v648_v53  ;;  %v556_v60 = vadd.f32 %v1646_v39, %v555_v57  ;;  %1402 = vmatmul.mubr.msk.f32.gmra.mrb[14].mxu1 %vm765_vm2, %v737_v51  ;;  %v739_v1 = vmul.f32 %v707_v52, %v611_v58 }
 0x118   : > { %v1481_v61 = vpop.eup %1480  ;;  %v738_v62 = vmul.f32 %v706_v56, %v610_v55  ;;  %v651_v63 = vmul.f32 0.70710677, %v1748_v49  ;;  %v619_v50 = vmul.f32 0.5, %v1748_v49 }
 0x119   : > { %v1483_v0 = vpop.eup %1482  ;;  %v709_v2 = vadd.f32 1.0, %v1481_v61  ;;  %v650_v3 = vmul.f32 0.70710677, %v556_v60  ;;  %v1365_v4 = vpop.f32.mrb[26].mxu0  ;;  %v618_v47 = vmul.f32 0.5, %v556_v60 }
 0x11a   : > { %v708_v7 = vadd.f32 1.0, %v1483_v0  ;;  %1492 = verf.f32 %v651_v63  ;;  %v1757_v59 = vadd.f32 %v1365_v4, %v1646_v39  ;;  %v565_v8 = vpop.f32.mrb[27].mxu0  ;;  %1404 = vmatprep.mubr.msk.f32.mxu1 %vm765_vm2, %v738_v62 }
 0x11b   : > { %1494 = verf.f32 %v650_v3  ;;  %v566_v10 = vadd.f32 %v1646_v39, %v565_v8  ;;  %1405 = vmatmul.mubr.msk.f32.gmra.mrb[16].mxu1 %vm765_vm2, %v739_v1  ;;  %v741_v15 = vmul.f32 %v709_v2, %v613_v9 }
 0x11c   : > { %v1485_v11 = vpop.eup %1484  ;;  %v740_v12 = vmul.f32 %v708_v7, %v612_v6  ;;  %v653_v13 = vmul.f32 0.70710677, %v1757_v59  ;;  %v621_v56 = vmul.f32 0.5, %v1757_v59 }
 0x11d   : > { %v1487_v14 = vpop.eup %1486  ;;  %v711_v16 = vadd.f32 1.0, %v1485_v11  ;;  %v652_v17 = vmul.f32 0.70710677, %v566_v10  ;;  %v1368_v18 = vpop.f32.mrb[28].mxu0  ;;  %v620_v54 = vmul.f32 0.5, %v566_v10 }
 0x11e   : > { %v710_v21 = vadd.f32 1.0, %v1487_v14  ;;  %1496 = verf.f32 %v653_v13  ;;  %v581_v5 = vadd.f32 %v1368_v18, %v1646_v39  ;;  %v575_v22 = vpop.f32.mrb[29].mxu0  ;;  %1407 = vmatprep.mubr.msk.f32.mxu1 %vm765_vm2, %v740_v12  ;;  %v1791_v11 = vld [vmem:[%s1903_s4] ss:$0 sm:$0xff] }
 0x11f   : > { %1498 = verf.f32 %v652_v17  ;;  %v576_v24 = vadd.f32 %v1646_v39, %v575_v22  ;;  %1408 = vmatmul.mubr.msk.f32.gmra.mrb[18].mxu1 %vm765_vm2, %v741_v15  ;;  %v743_v29 = vmul.f32 %v711_v16, %v615_v23 }
 0x120   : > { %v1489_v25 = vpop.eup %1488  ;;  %v742_v26 = vmul.f32 %v710_v21, %v614_v19  ;;  %v655_v27 = vmul.f32 0.70710677, %v581_v5  ;;  %v623_v0 = vmul.f32 0.5, %v581_v5 }
 0x121   : > { %v1491_v28 = vpop.eup %1490  ;;  %v713_v30 = vadd.f32 1.0, %v1489_v25  ;;  %v654_v31 = vmul.f32 0.70710677, %v576_v24  ;;  %v1371_v32 = vpop.f32.mrb[30].mxu0  ;;  %v622_v62 = vmul.f32 0.5, %v576_v24 }
 0x122   : > { %v712_v35 = vadd.f32 1.0, %v1491_v28  ;;  %1500 = verf.f32 %v655_v27  ;;  %v591_v36 = vadd.f32 %v1371_v32, %v1646_v39  ;;  %v585_v20 = vpop.f32.mrb[31].mxu0  ;;  %1410 = vmatprep.mubr.msk.f32.mxu1 %vm765_vm2, %v742_v26 }
 0x123   : > { %1502 = verf.f32 %v654_v31  ;;  %v586_v38 = vadd.f32 %v1646_v39, %v585_v20  ;;  %1411 = vmatmul.mubr.msk.f32.gmra.mrb[20].mxu1 %vm765_vm2, %v743_v29  ;;  %v745_v44 = vmul.f32 %v713_v30, %v617_v37 }
 0x124   : > { %v1493_v40 = vpop.eup %1492  ;;  %v744_v41 = vmul.f32 %v712_v35, %v616_v33  ;;  %v657_v42 = vmul.f32 0.70710677, %v591_v36  ;;  %v625_v8 = vmul.f32 0.5, %v591_v36 }
 0x125   : > { %v1495_v43 = vpop.eup %1494  ;;  %v715_v45 = vadd.f32 1.0, %v1493_v40  ;;  %v656_v46 = vmul.f32 0.70710677, %v586_v38  ;;  %v624_v7 = vmul.f32 0.5, %v586_v38 }
 0x126   : > { %v714_v48 = vadd.f32 1.0, %v1495_v43  ;;  %1504 = verf.f32 %v657_v42  ;;  %1413 = vmatprep.mubr.msk.f32.mxu1 %vm765_vm2, %v744_v41 }
 0x127   : > { %1506 = verf.f32 %v656_v46  ;;  %1414 = vmatmul.mubr.msk.f32.gmra.mrb[22].mxu1 %vm765_vm2, %v745_v44  ;;  %v747_v52 = vmul.f32 %v715_v45, %v619_v50 }
 0x128   : > { %v1497_v39 = vpop.eup %1496  ;;  %v746_v34 = vmul.f32 %v714_v48, %v618_v47 }
 0x129   : > { %v1499_v51 = vpop.eup %1498  ;;  %v717_v53 = vadd.f32 1.0, %v1497_v39 }
 0x12a   : > { %v716_v55 = vadd.f32 1.0, %v1499_v51  ;;  %1416 = vmatprep.mubr.msk.f32.mxu1 %vm765_vm2, %v746_v34 }
 0x12b   : > { %1417 = vmatmul.mubr.msk.f32.gmra.mrb[24].mxu1 %vm765_vm2, %v747_v52  ;;  %v749_v49 = vmul.f32 %v717_v53, %v621_v56 }
 0x12c   : > { %v1501_v57 = vpop.eup %1500  ;;  %v748_v58 = vmul.f32 %v716_v55, %v620_v54 }
 0x12d   : > { %v1503_v60 = vpop.eup %1502  ;;  %v719_v61 = vadd.f32 1.0, %v1501_v57 }
 0x12e   : > { %v718_v63 = vadd.f32 1.0, %v1503_v60  ;;  %1419 = vmatprep.mubr.msk.f32.mxu1 %vm765_vm2, %v748_v58 }
 0x12f   : > { %1420 = vmatmul.mubr.msk.f32.gmra.mrb[26].mxu1 %vm765_vm2, %v749_v49  ;;  %v751_v4 = vmul.f32 %v719_v61, %v623_v0 }
 0x130   : > { %v1505_v1 = vpop.eup %1504  ;;  %v750_v2 = vmul.f32 %v718_v63, %v622_v62 }
 0x131   : > { %v1507_v3 = vpop.eup %1506  ;;  %v721_v6 = vadd.f32 1.0, %v1505_v1 }
 0x132   : > { %v720_v59 = vadd.f32 1.0, %v1507_v3  ;;  %1422 = vmatprep.mubr.msk.f32.mxu1 %vm765_vm2, %v750_v2 }
 0x133   : > { %1423 = vmatmul.mubr.msk.f32.gmra.mrb[28].mxu1 %vm765_vm2, %v751_v4  ;;  %v753_v10 = vmul.f32 %v721_v6, %v625_v8 }
 0x134   : > { %v752_v9 = vmul.f32 %v720_v59, %v624_v7 }
 0x136   : > { %1425 = vmatprep.mubr.msk.f32.mxu1 %vm765_vm2, %v752_v9 }
 0x137   : > { %1426 = vmatmul.mubr.msk.f32.gmra.mrb[30].mxu1 %vm765_vm2, %v753_v10 }
 0x1ce   : > { %v1382_v12 = vpop.f32.mrb[0].mxu1 }
 0x1cf   : > { %v934_v13 = vadd.f32 %v1382_v12, %v1791_v11  ;;  %v928_v14 = vpop.f32.mrb[1].mxu1 }
 0x1d0   : > { %v929_v15 = vadd.f32 %v1791_v11, %v928_v14 }
 0x1d1   : > { %1088 = vst.msk [vmem:[%s1798_s16 + $0x8] sm:$0xff] %vm268_vm1, %v934_v13 }
 0x1d2   : > { %1087 = vst.msk [vmem:[%s1798_s16] sm:$0xff] %vm268_vm1, %v929_v15  ;;  %v1385_v16 = vpop.f32.mrb[2].mxu1 }
 0x1d3   : > { %v944_v17 = vadd.f32 %v1385_v16, %v1791_v11  ;;  %v938_v18 = vpop.f32.mrb[3].mxu1 }
 0x1d4   : > { %v939_v19 = vadd.f32 %v1791_v11, %v938_v18 }
 0x1d5   : > { %1090 = vst.msk [vmem:[%s1798_s16 + $0x18] sm:$0xff] %vm268_vm1, %v944_v17 }
 0x1d6   : > { %1089 = vst.msk [vmem:[%s1798_s16 + $0x10] sm:$0xff] %vm268_vm1, %v939_v19  ;;  %v1388_v21 = vpop.f32.mrb[4].mxu1 }
 0x1d7   : > { %v954_v5 = vadd.f32 %v1388_v21, %v1791_v11  ;;  %v948_v22 = vpop.f32.mrb[5].mxu1 }
 0x1d8   : > { %v949_v23 = vadd.f32 %v1791_v11, %v948_v22 }
 0x1d9   : > { %1092 = vst.msk [vmem:[%s1798_s16 + $0x28] sm:$0xff] %vm268_vm1, %v954_v5 }
 0x1da   : > { %1091 = vst.msk [vmem:[%s1798_s16 + $0x20] sm:$0xff] %vm268_vm1, %v949_v23  ;;  %v1391_v24 = vpop.f32.mrb[6].mxu1 }
 0x1db   : > { %v964_v25 = vadd.f32 %v1391_v24, %v1791_v11  ;;  %v958_v26 = vpop.f32.mrb[7].mxu1 }
 0x1dc   : > { %v959_v27 = vadd.f32 %v1791_v11, %v958_v26 }
 0x1dd   : > { %1094 = vst.msk [vmem:[%s1798_s16 + $0x38] sm:$0xff] %vm268_vm1, %v964_v25 }
 0x1de   : > { %1093 = vst.msk [vmem:[%s1798_s16 + $0x30] sm:$0xff] %vm268_vm1, %v959_v27  ;;  %v1394_v28 = vpop.f32.mrb[8].mxu1 }
 0x1df   : > { %v974_v29 = vadd.f32 %v1394_v28, %v1791_v11  ;;  %v968_v30 = vpop.f32.mrb[9].mxu1 }
 0x1e0   : > { %v969_v31 = vadd.f32 %v1791_v11, %v968_v30 }
 0x1e1   : > { %1096 = vst.msk [vmem:[%s1798_s16 + $0x48] sm:$0xff] %vm268_vm1, %v974_v29 }
 0x1e2   : > { %1095 = vst.msk [vmem:[%s1798_s16 + $0x40] sm:$0xff] %vm268_vm1, %v969_v31  ;;  %v1397_v32 = vpop.f32.mrb[10].mxu1 }
 0x1e3   : > { %v984_v33 = vadd.f32 %v1397_v32, %v1791_v11  ;;  %v978_v35 = vpop.f32.mrb[11].mxu1 }
 0x1e4   : > { %v979_v36 = vadd.f32 %v1791_v11, %v978_v35 }
 0x1e5   : > { %1098 = vst.msk [vmem:[%s1798_s16 + $0x58] sm:$0xff] %vm268_vm1, %v984_v33 }
 0x1e6   : > { %1097 = vst.msk [vmem:[%s1798_s16 + $0x50] sm:$0xff] %vm268_vm1, %v979_v36  ;;  %v1400_v20 = vpop.f32.mrb[12].mxu1 }
 0x1e7   : > { %v994_v37 = vadd.f32 %v1400_v20, %v1791_v11  ;;  %v988_v38 = vpop.f32.mrb[13].mxu1 }
 0x1e8   : > { %v989_v40 = vadd.f32 %v1791_v11, %v988_v38 }
 0x1e9   : > { %1100 = vst.msk [vmem:[%s1798_s16 + $0x68] sm:$0xff] %vm268_vm1, %v994_v37 }
 0x1ea   : > { %1099 = vst.msk [vmem:[%s1798_s16 + $0x60] sm:$0xff] %vm268_vm1, %v989_v40  ;;  %v1403_v41 = vpop.f32.mrb[14].mxu1 }
 0x1eb   : > { %v1004_v42 = vadd.f32 %v1403_v41, %v1791_v11  ;;  %v998_v43 = vpop.f32.mrb[15].mxu1 }
 0x1ec   : > { %v999_v44 = vadd.f32 %v1791_v11, %v998_v43 }
 0x1ed   : > { %1102 = vst.msk [vmem:[%s1798_s16 + $0x78] sm:$0xff] %vm268_vm1, %v1004_v42 }
 0x1ee   : > { %1101 = vst.msk [vmem:[%s1798_s16 + $0x70] sm:$0xff] %vm268_vm1, %v999_v44  ;;  %v1406_v45 = vpop.f32.mrb[16].mxu1 }
 0x1ef   : > { %v1014_v46 = vadd.f32 %v1406_v45, %v1791_v11  ;;  %v1008_v47 = vpop.f32.mrb[17].mxu1 }
 0x1f0   : > { %v1009_v48 = vadd.f32 %v1791_v11, %v1008_v47 }
 0x1f1   : > { %1104 = vst.msk [vmem:[%s1798_s16 + $0x88] sm:$0xff] %vm268_vm1, %v1014_v46 }
 0x1f2   : > { %1103 = vst.msk [vmem:[%s1798_s16 + $0x80] sm:$0xff] %vm268_vm1, %v1009_v48  ;;  %v1409_v50 = vpop.f32.mrb[18].mxu1 }
 0x1f3   : > { %v1024_v39 = vadd.f32 %v1409_v50, %v1791_v11  ;;  %v1018_v34 = vpop.f32.mrb[19].mxu1 }
 0x1f4   : > { %v1019_v51 = vadd.f32 %v1791_v11, %v1018_v34 }
 0x1f5   : > { %1106 = vst.msk [vmem:[%s1798_s16 + $0x98] sm:$0xff] %vm268_vm1, %v1024_v39 }
 0x1f6   : > { %1105 = vst.msk [vmem:[%s1798_s16 + $0x90] sm:$0xff] %vm268_vm1, %v1019_v51  ;;  %v1412_v52 = vpop.f32.mrb[20].mxu1 }
 0x1f7   : > { %v1034_v53 = vadd.f32 %v1412_v52, %v1791_v11  ;;  %v1028_v54 = vpop.f32.mrb[21].mxu1 }
 0x1f8   : > { %v1029_v55 = vadd.f32 %v1791_v11, %v1028_v54 }
 0x1f9   : > { %1108 = vst.msk [vmem:[%s1798_s16 + $0xa8] sm:$0xff] %vm268_vm1, %v1034_v53 }
 0x1fa   : > { %1107 = vst.msk [vmem:[%s1798_s16 + $0xa0] sm:$0xff] %vm268_vm1, %v1029_v55  ;;  %v1415_v56 = vpop.f32.mrb[22].mxu1 }
 0x1fb   : > { %v1044_v57 = vadd.f32 %v1415_v56, %v1791_v11  ;;  %v1038_v58 = vpop.f32.mrb[23].mxu1 }
 0x1fc   : > { %v1039_v60 = vadd.f32 %v1791_v11, %v1038_v58 }
 0x1fd   : > { %1110 = vst.msk [vmem:[%s1798_s16 + $0xb8] sm:$0xff] %vm268_vm1, %v1044_v57 }
 0x1fe   : > { %1109 = vst.msk [vmem:[%s1798_s16 + $0xb0] sm:$0xff] %vm268_vm1, %v1039_v60  ;;  %v1418_v49 = vpop.f32.mrb[24].mxu1 }
 0x1ff   : > { %v1054_v61 = vadd.f32 %v1418_v49, %v1791_v11  ;;  %v1048_v62 = vpop.f32.mrb[25].mxu1 }
 0x200   : > { %v1049_v63 = vadd.f32 %v1791_v11, %v1048_v62 }
 0x201   : > { %1112 = vst.msk [vmem:[%s1798_s16 + $0xc8] sm:$0xff] %vm268_vm1, %v1054_v61 }
 0x202   : > { %1111 = vst.msk [vmem:[%s1798_s16 + $0xc0] sm:$0xff] %vm268_vm1, %v1049_v63  ;;  %v1421_v0 = vpop.f32.mrb[26].mxu1 }
 0x203   : > { %v1064_v1 = vadd.f32 %v1421_v0, %v1791_v11  ;;  %v1058_v2 = vpop.f32.mrb[27].mxu1 }
 0x204   : > { %v1059_v3 = vadd.f32 %v1791_v11, %v1058_v2 }
 0x205   : > { %1114 = vst.msk [vmem:[%s1798_s16 + $0xd8] sm:$0xff] %vm268_vm1, %v1064_v1 }
 0x206   : > { %1113 = vst.msk [vmem:[%s1798_s16 + $0xd0] sm:$0xff] %vm268_vm1, %v1059_v3  ;;  %v1424_v4 = vpop.f32.mrb[28].mxu1 }
 0x207   : > { %v1074_v6 = vadd.f32 %v1424_v4, %v1791_v11  ;;  %v1068_v7 = vpop.f32.mrb[29].mxu1 }
 0x208   : > { %v1069_v59 = vadd.f32 %v1791_v11, %v1068_v7 }
 0x209   : > { %1116 = vst.msk [vmem:[%s1798_s16 + $0xe8] sm:$0xff] %vm268_vm1, %v1074_v6 }
 0x20a   : > { %1115 = vst.msk [vmem:[%s1798_s16 + $0xe0] sm:$0xff] %vm268_vm1, %v1069_v59  ;;  %v1427_v8 = vpop.f32.mrb[30].mxu1 }
 0x20b   : > { %v1084_v9 = vadd.f32 %v1427_v8, %v1791_v11  ;;  %v1078_v10 = vpop.f32.mrb[31].mxu1 }
 0x20c   : > { %v1079_v12 = vadd.f32 %v1791_v11, %v1078_v10 }
 0x20d   : > { %1118 = vst.msk [vmem:[%s1798_s16 + $0xf8] sm:$0xff] %vm268_vm1, %v1084_v9 }
 0x20e   : > { %1117 = vst.msk [vmem:[%s1798_s16 + $0xf0] sm:$0xff] %vm268_vm1, %v1079_v12 }
 0x20f PF: > { %s15_s18 = sadd.s32 1, %s1514_s18  }
 0x210   : > { %p12_p4 = scmp.ge.s32.totalorder %s15_s18, 4  }
 0x212   :  { %14 = sbr.rel (!%p12_p4) target bundleno = 1 (0x1), region = 70 }

</bundles_post_ra>
